<compile_context>
chip_gen: v7x
topology: tpu7x:2x2x1
jax: 0.10.0
libtpu: 0.0.40
codegen_flags: <defaults>
</compile_context>

<pallas_src>
import math

import jax
import jax.numpy as jnp
from jax import lax
from jax.experimental import pallas as pl
from jax.experimental.pallas import tpu as pltpu  # noqa: F401  (kept for parity/debug helpers)

# ---- model configuration (small, consistent with the module) ----------------
HIDDEN = 32          # config['hidden_size']
HEADS = 2            # config['num_attention_heads']
HEAD_DIM = HIDDEN // HEADS
INNER = 4 * HIDDEN   # FeedForward inner size
SEQ = 8
BATCH = 2
NUM_LAYERS = 2       # config['num_hidden_layers']
LN_EPS = 1e-12

# indices into the "smalls" slab (L, 6, 1, H)
_BO, _LN1_G, _LN1_B, _B2, _LN2_G, _LN2_B = range(6)


# ---- in-kernel helpers -------------------------------------------------------
def _erf(x):
    # Abramowitz & Stegun 7.1.26 rational approximation of erf
    # (max abs error ~1.5e-7, i.e. float32-exact); avoids relying on a
    # lax.erf_p lowering inside Mosaic.
    p = 0.3275911
    a1, a2, a3, a4, a5 = (0.254829592, -0.284496736, 1.421413741,
                          -1.453152027, 1.061405429)
    sgn = jnp.where(x >= 0.0, 1.0, -1.0)
    ax = jnp.abs(x)
    t = 1.0 / (1.0 + p * ax)
    poly = ((((a5 * t + a4) * t + a3) * t + a2) * t + a1) * t
    return sgn * (1.0 - poly * jnp.exp(-ax * ax))


def _gelu(x):
    # exact (erf-based) gelu: x * 0.5 * (1 + erf(x / sqrt(2)))
    return x * 0.5 * (1.0 + _erf(x / math.sqrt(2.0)))


def _layernorm(x, gamma, beta):
    # TF-style layernorm: biased variance, eps inside the sqrt (rsqrt -> EUP)
    u = jnp.mean(x, axis=-1, keepdims=True)
    s = jnp.mean((x - u) ** 2, axis=-1, keepdims=True)
    return gamma * ((x - u) * lax.rsqrt(s + LN_EPS)) + beta


# ---- fused whole-encoder kernel (grid-less, single invocation) ---------------
def _make_encoder_kernel(store_all):
    inv_sqrt_d = 1.0 / math.sqrt(HEAD_DIM)

    def kernel(x_ref, mask_ref, wqkv_ref, bqkv_ref, wo_ref,
               w1_ref, b1_ref, w2_ref, small_ref, out_ref):
        h2d = x_ref[...].astype(jnp.float32)                     # (B*S, H)

        for l in range(NUM_LAYERS):        # static: activation stays on-chip
            # ---- per-head Q/K/V projections on the flattened activation ----
            # static Ref indexing -> no lane-slicing of a computed fused-QKV.
            q, k, v = [], [], []
            for nh in range(HEADS):
                base = 3 * nh
                q.append(jnp.dot(h2d, wqkv_ref[l, base + 0],
                                 preferred_element_type=jnp.float32)
                         + bqkv_ref[l, base + 0])                 # (B*S, hd)
                k.append(jnp.dot(h2d, wqkv_ref[l, base + 1],
                                 preferred_element_type=jnp.float32)
                         + bqkv_ref[l, base + 1])
                v.append(jnp.dot(h2d, wqkv_ref[l, base + 2],
                                 preferred_element_type=jnp.float32)
                         + bqkv_ref[l, base + 2])

            # ---- attention: static per-(batch, head) loop (mask per batch) --
            attn_parts = []
            for b in range(BATCH):
                mask_b = mask_ref[b].astype(jnp.float32)          # (S, S) additive
                attn_b = jnp.zeros((SEQ, HIDDEN), jnp.float32)
                lo, hi = b * SEQ, (b + 1) * SEQ                   # 8-sublane aligned
                for nh in range(HEADS):
                    qb = q[nh][lo:hi, :]                          # (S, hd)
                    kb = k[nh][lo:hi, :]
                    vb = v[nh][lo:hi, :]
                    # scores = qb @ kb.T / sqrt(hd) + mask (kb transpose -> XLU, cheap)
                    scores = lax.dot_general(qb, kb, (((1,), (1,)), ((), ())),
                                             preferred_element_type=jnp.float32)
                    scores = scores * inv_sqrt_d + mask_b
                    # numerically-stable softmax, EXACT division (parity with torch)
                    scores = scores - jnp.max(scores, axis=-1, keepdims=True)
                    probs = jnp.exp(scores)
                    probs = probs / jnp.sum(probs, axis=-1, keepdims=True)
                    ctx = jnp.dot(probs, vb,
                                  preferred_element_type=jnp.float32)      # (S, hd)
                    # accumulate the output projection per head (no concat)
                    attn_b = attn_b + jnp.dot(ctx, wo_ref[l, nh],
                                              preferred_element_type=jnp.float32)
                attn_parts.append(attn_b)
            attn2d = jnp.concatenate(attn_parts, axis=0) + small_ref[l, _BO]

            # attn dropout / out dropout are identity in eval mode
            h1 = _layernorm(attn2d + h2d,
                            small_ref[l, _LN1_G], small_ref[l, _LN1_B])

            # ---- feed-forward: dense -> gelu -> dense + residual + LayerNorm
            inter = _gelu(jnp.dot(h1, w1_ref[l],
                                  preferred_element_type=jnp.float32) + b1_ref[l])
            ffn = jnp.dot(inter, w2_ref[l],
                          preferred_element_type=jnp.float32) + small_ref[l, _B2]
            h2d = _layernorm(ffn + h1,
                             small_ref[l, _LN2_G], small_ref[l, _LN2_B])

            if store_all:                   # only the all-layers variant writes per layer
                out_ref[l] = h2d.astype(out_ref.dtype)

        if not store_all:                   # default path: single final writeback
            out_ref[...] = h2d.astype(out_ref.dtype)

    return kernel


# ---- wrapper: single grid-less pallas_call for the whole encoder -------------
def _stack_params(layer_params):
    """Stack per-layer weights along a leading L axis in MXU/layout-friendly form."""

    def per_head_w(p):
        slabs = []
        for nh in range(HEADS):
            for name in ('wq', 'wk', 'wv'):
                slabs.append(p[name][:, nh * HEAD_DIM:(nh + 1) * HEAD_DIM])
        return jnp.stack(slabs)                                   # (3*HEADS, H, hd)

    def per_head_b(p):
        slabs = []
        for nh in range(HEADS):
            for name in ('bq', 'bk', 'bv'):
                slabs.append(p[name][nh * HEAD_DIM:(nh + 1) * HEAD_DIM]
                             .reshape(1, HEAD_DIM))
        return jnp.stack(slabs)                                   # (3*HEADS, 1, hd)

    def smalls(p):
        return jnp.stack([p['bo'], p['ln1_g'], p['ln1_b'],
                          p['b2'], p['ln2_g'], p['ln2_b']]).reshape(6, 1, HIDDEN)

    def st(fn):
        return jnp.stack([fn(p) for p in layer_params])

    return (
        st(per_head_w),                                           # (L, 3*HEADS, H, hd)
        st(per_head_b),                                           # (L, 3*HEADS, 1, hd)
        st(lambda p: p['wo'].reshape(HEADS, HEAD_DIM, HIDDEN)),   # (L, HEADS, hd, H)
        st(lambda p: p['w1']),                                    # (L, H, INNER)
        st(lambda p: p['b1'].reshape(1, INNER)),                  # (L, 1, INNER)
        st(lambda p: p['w2']),                                    # (L, INNER, H)
        st(smalls),                                               # (L, 6, 1, H)
    )


def transformer_encoder(x, attention_mask, layer_params,
                        output_all_encoded_layers=False):
    """Mirrors TransformerEncoder.forward: returns a list of layer outputs."""
    B, S, H = x.shape
    assert attention_mask.shape[1] == 1, \
        "per-head attention masks are not supported; expected (B, 1, S, S)"
    stacked = _stack_params(layer_params)
    mask = attention_mask[:, 0, :, :]                  # (B, S, S) additive
    x2d = x.reshape(B * S, H)                          # flatten batch into MXU rows

    kernel = _make_encoder_kernel(output_all_encoded_layers)
    if output_all_encoded_layers:
        out_shape = jax.ShapeDtypeStruct((NUM_LAYERS, B * S, H), x.dtype)
    else:
        out_shape = jax.ShapeDtypeStruct((B * S, H), x.dtype)

    # Grid-less call: every input is a single whole-array VMEM block
    # (default BlockSpec), weights loaded exactly once, one XLA dispatch.
    out = pl.pallas_call(kernel, out_shape=out_shape)(x2d, mask, *stacked)

    all_encoder_layers = [x]
    if output_all_encoded_layers:
        all_encoder_layers += [out[l].reshape(B, S, H) for l in range(NUM_LAYERS)]
    else:
        all_encoder_layers.append(out.reshape(B, S, H))
    return all_encoder_layers


# ---- deterministic parameter init --------------------------------------------
def init_layer_params(key):
    ks = jax.random.split(key, 6)

    def lin(k, fan_in, fan_out):
        return 0.02 * jax.random.normal(k, (fan_in, fan_out), jnp.float32)

    zeros = lambda n: jnp.zeros((n,), jnp.float32)
    ones = lambda n: jnp.ones((n,), jnp.float32)
    return dict(
        wq=lin(ks[0], HIDDEN, HIDDEN), bq=zeros(HIDDEN),
        wk=lin(ks[1], HIDDEN, HIDDEN), bk=zeros(HIDDEN),
        wv=lin(ks[2], HIDDEN, HIDDEN), bv=zeros(HIDDEN),
        wo=lin(ks[3], HIDDEN, HIDDEN), bo=zeros(HIDDEN),
        ln1_g=ones(HIDDEN), ln1_b=zeros(HIDDEN),
        w1=lin(ks[4], HIDDEN, INNER), b1=zeros(INNER),
        w2=lin(ks[5], INNER, HIDDEN), b2=zeros(HIDDEN),
        ln2_g=ones(HIDDEN), ln2_b=zeros(HIDDEN),
    )


if __name__ == "__main__":
    key = jax.random.PRNGKey(0)
    kx, kp = jax.random.split(key)

    x = jax.random.normal(kx, (BATCH, SEQ, HIDDEN), jnp.float32)

    # additive attention mask (B, 1, S, S): 0 = attend, -1e9 = masked (causal)
    causal = jnp.tril(jnp.ones((SEQ, SEQ), jnp.float32))
    attention_mask = jnp.broadcast_to((1.0 - causal)[None, None] * (-1e9),
                                      (BATCH, 1, SEQ, SEQ))

    layer_keys = jax.random.split(kp, NUM_LAYERS)
    layer_params = [init_layer_params(k) for k in layer_keys]

    outs = transformer_encoder(x, attention_mask, layer_params,
                               output_all_encoded_layers=False)
    jax.block_until_ready(outs[-1])
    print("KERNEL_OK")
</pallas_src>

<mosaic_0001>
module attributes {stable_mosaic.version = 11 : i64} {
  func.func @kernel(%arg0: memref<16x32xf32, #tpu.memory_space<vmem>>, %arg1: memref<2x8x8xf32, #tpu.memory_space<vmem>>, %arg2: memref<2x6x32x16xf32, #tpu.memory_space<vmem>>, %arg3: memref<2x6x1x16xf32, #tpu.memory_space<vmem>>, %arg4: memref<2x2x16x32xf32, #tpu.memory_space<vmem>>, %arg5: memref<2x32x128xf32, #tpu.memory_space<vmem>>, %arg6: memref<2x1x128xf32, #tpu.memory_space<vmem>>, %arg7: memref<2x128x32xf32, #tpu.memory_space<vmem>>, %arg8: memref<2x6x1x32xf32, #tpu.memory_space<vmem>>, %arg9: memref<16x32xf32, #tpu.memory_space<vmem>>) attributes {dimension_semantics = [], scalar_prefetch = 0 : i64, scratch_operands = 0 : i64, tpu.core_type = #tpu.core_type<tc>} {
    %c0 = arith.constant 0 : index
    %c0_0 = arith.constant 0 : index
    %0 = vector.load %arg0[%c0, %c0_0] : memref<16x32xf32, #tpu.memory_space<vmem>>, vector<16x32xf32>
    %c0_1 = arith.constant 0 : index
    %c0_2 = arith.constant 0 : index
    %c0_3 = arith.constant 0 : index
    %c0_4 = arith.constant 0 : index
    %1 = vector.load %arg2[%c0_1, %c0_2, %c0_3, %c0_4] : memref<2x6x32x16xf32, #tpu.memory_space<vmem>>, vector<1x1x32x16xf32>
    %2 = vector.shape_cast %1 : vector<1x1x32x16xf32> to vector<32x16xf32>
    %cst = arith.constant dense<0.000000e+00> : vector<16x16xf32>
    %3 = tpu.matmul %0, %2, %cst {dimension_numbers = #tpu.dot_dimension_numbers<[1], [0], [0], [1], [0, 0, 1, 1], [], []>} : vector<16x32xf32>, vector<32x16xf32>, vector<16x16xf32> -> vector<16x16xf32>
    %c0_5 = arith.constant 0 : index
    %c0_6 = arith.constant 0 : index
    %c0_7 = arith.constant 0 : index
    %c0_8 = arith.constant 0 : index
    %4 = vector.load %arg3[%c0_5, %c0_6, %c0_7, %c0_8] : memref<2x6x1x16xf32, #tpu.memory_space<vmem>>, vector<1x1x1x16xf32>
    %5 = vector.shape_cast %4 : vector<1x1x1x16xf32> to vector<1x16xf32>
    %6 = vector.broadcast %5 : vector<1x16xf32> to vector<16x16xf32>
    %7 = arith.addf %3, %6 : vector<16x16xf32>
    %c0_9 = arith.constant 0 : index
    %c1 = arith.constant 1 : index
    %c0_10 = arith.constant 0 : index
    %c0_11 = arith.constant 0 : index
    %8 = vector.load %arg2[%c0_9, %c1, %c0_10, %c0_11] : memref<2x6x32x16xf32, #tpu.memory_space<vmem>>, vector<1x1x32x16xf32>
    %9 = vector.shape_cast %8 : vector<1x1x32x16xf32> to vector<32x16xf32>
    %cst_12 = arith.constant dense<0.000000e+00> : vector<16x16xf32>
    %10 = tpu.matmul %0, %9, %cst_12 {dimension_numbers = #tpu.dot_dimension_numbers<[1], [0], [0], [1], [0, 0, 1, 1], [], []>} : vector<16x32xf32>, vector<32x16xf32>, vector<16x16xf32> -> vector<16x16xf32>
    %c0_13 = arith.constant 0 : index
    %c1_14 = arith.constant 1 : index
    %c0_15 = arith.constant 0 : index
    %c0_16 = arith.constant 0 : index
    %11 = vector.load %arg3[%c0_13, %c1_14, %c0_15, %c0_16] : memref<2x6x1x16xf32, #tpu.memory_space<vmem>>, vector<1x1x1x16xf32>
    %12 = vector.shape_cast %11 : vector<1x1x1x16xf32> to vector<1x16xf32>
    %13 = vector.broadcast %12 : vector<1x16xf32> to vector<16x16xf32>
    %14 = arith.addf %10, %13 : vector<16x16xf32>
    %c0_17 = arith.constant 0 : index
    %c2 = arith.constant 2 : index
    %c0_18 = arith.constant 0 : index
    %c0_19 = arith.constant 0 : index
    %15 = vector.load %arg2[%c0_17, %c2, %c0_18, %c0_19] : memref<2x6x32x16xf32, #tpu.memory_space<vmem>>, vector<1x1x32x16xf32>
    %16 = vector.shape_cast %15 : vector<1x1x32x16xf32> to vector<32x16xf32>
    %cst_20 = arith.constant dense<0.000000e+00> : vector<16x16xf32>
    %17 = tpu.matmul %0, %16, %cst_20 {dimension_numbers = #tpu.dot_dimension_numbers<[1], [0], [0], [1], [0, 0, 1, 1], [], []>} : vector<16x32xf32>, vector<32x16xf32>, vector<16x16xf32> -> vector<16x16xf32>
    %c0_21 = arith.constant 0 : index
    %c2_22 = arith.constant 2 : index
    %c0_23 = arith.constant 0 : index
    %c0_24 = arith.constant 0 : index
    %18 = vector.load %arg3[%c0_21, %c2_22, %c0_23, %c0_24] : memref<2x6x1x16xf32, #tpu.memory_space<vmem>>, vector<1x1x1x16xf32>
    %19 = vector.shape_cast %18 : vector<1x1x1x16xf32> to vector<1x16xf32>
    %20 = vector.broadcast %19 : vector<1x16xf32> to vector<16x16xf32>
    %21 = arith.addf %17, %20 : vector<16x16xf32>
    %c0_25 = arith.constant 0 : index
    %c3 = arith.constant 3 : index
    %c0_26 = arith.constant 0 : index
    %c0_27 = arith.constant 0 : index
    %22 = vector.load %arg2[%c0_25, %c3, %c0_26, %c0_27] : memref<2x6x32x16xf32, #tpu.memory_space<vmem>>, vector<1x1x32x16xf32>
    %23 = vector.shape_cast %22 : vector<1x1x32x16xf32> to vector<32x16xf32>
    %cst_28 = arith.constant dense<0.000000e+00> : vector<16x16xf32>
    %24 = tpu.matmul %0, %23, %cst_28 {dimension_numbers = #tpu.dot_dimension_numbers<[1], [0], [0], [1], [0, 0, 1, 1], [], []>} : vector<16x32xf32>, vector<32x16xf32>, vector<16x16xf32> -> vector<16x16xf32>
    %c0_29 = arith.constant 0 : index
    %c3_30 = arith.constant 3 : index
    %c0_31 = arith.constant 0 : index
    %c0_32 = arith.constant 0 : index
    %25 = vector.load %arg3[%c0_29, %c3_30, %c0_31, %c0_32] : memref<2x6x1x16xf32, #tpu.memory_space<vmem>>, vector<1x1x1x16xf32>
    %26 = vector.shape_cast %25 : vector<1x1x1x16xf32> to vector<1x16xf32>
    %27 = vector.broadcast %26 : vector<1x16xf32> to vector<16x16xf32>
    %28 = arith.addf %24, %27 : vector<16x16xf32>
    %c0_33 = arith.constant 0 : index
    %c4 = arith.constant 4 : index
    %c0_34 = arith.constant 0 : index
    %c0_35 = arith.constant 0 : index
    %29 = vector.load %arg2[%c0_33, %c4, %c0_34, %c0_35] : memref<2x6x32x16xf32, #tpu.memory_space<vmem>>, vector<1x1x32x16xf32>
    %30 = vector.shape_cast %29 : vector<1x1x32x16xf32> to vector<32x16xf32>
    %cst_36 = arith.constant dense<0.000000e+00> : vector<16x16xf32>
    %31 = tpu.matmul %0, %30, %cst_36 {dimension_numbers = #tpu.dot_dimension_numbers<[1], [0], [0], [1], [0, 0, 1, 1], [], []>} : vector<16x32xf32>, vector<32x16xf32>, vector<16x16xf32> -> vector<16x16xf32>
    %c0_37 = arith.constant 0 : index
    %c4_38 = arith.constant 4 : index
    %c0_39 = arith.constant 0 : index
    %c0_40 = arith.constant 0 : index
    %32 = vector.load %arg3[%c0_37, %c4_38, %c0_39, %c0_40] : memref<2x6x1x16xf32, #tpu.memory_space<vmem>>, vector<1x1x1x16xf32>
    %33 = vector.shape_cast %32 : vector<1x1x1x16xf32> to vector<1x16xf32>
    %34 = vector.broadcast %33 : vector<1x16xf32> to vector<16x16xf32>
    %35 = arith.addf %31, %34 : vector<16x16xf32>
    %c0_41 = arith.constant 0 : index
    %c5 = arith.constant 5 : index
    %c0_42 = arith.constant 0 : index
    %c0_43 = arith.constant 0 : index
    %36 = vector.load %arg2[%c0_41, %c5, %c0_42, %c0_43] : memref<2x6x32x16xf32, #tpu.memory_space<vmem>>, vector<1x1x32x16xf32>
    %37 = vector.shape_cast %36 : vector<1x1x32x16xf32> to vector<32x16xf32>
    %cst_44 = arith.constant dense<0.000000e+00> : vector<16x16xf32>
    %38 = tpu.matmul %0, %37, %cst_44 {dimension_numbers = #tpu.dot_dimension_numbers<[1], [0], [0], [1], [0, 0, 1, 1], [], []>} : vector<16x32xf32>, vector<32x16xf32>, vector<16x16xf32> -> vector<16x16xf32>
    %c0_45 = arith.constant 0 : index
    %c5_46 = arith.constant 5 : index
    %c0_47 = arith.constant 0 : index
    %c0_48 = arith.constant 0 : index
    %39 = vector.load %arg3[%c0_45, %c5_46, %c0_47, %c0_48] : memref<2x6x1x16xf32, #tpu.memory_space<vmem>>, vector<1x1x1x16xf32>
    %40 = vector.shape_cast %39 : vector<1x1x1x16xf32> to vector<1x16xf32>
    %41 = vector.broadcast %40 : vector<1x16xf32> to vector<16x16xf32>
    %42 = arith.addf %38, %41 : vector<16x16xf32>
    %c0_49 = arith.constant 0 : index
    %c0_50 = arith.constant 0 : index
    %c0_51 = arith.constant 0 : index
    %43 = vector.load %arg1[%c0_49, %c0_50, %c0_51] : memref<2x8x8xf32, #tpu.memory_space<vmem>>, vector<1x8x8xf32>
    %44 = vector.shape_cast %43 : vector<1x8x8xf32> to vector<8x8xf32>
    %cst_52 = arith.constant 0.000000e+00 : f32
    %45 = vector.broadcast %cst_52 : f32 to vector<8x32xf32>
    %46 = vector.extract_strided_slice %7 {offsets = [0, 0], sizes = [8, 16], strides = [1, 1]} : vector<16x16xf32> to vector<8x16xf32>
    %47 = vector.extract_strided_slice %14 {offsets = [0, 0], sizes = [8, 16], strides = [1, 1]} : vector<16x16xf32> to vector<8x16xf32>
    %48 = vector.extract_strided_slice %21 {offsets = [0, 0], sizes = [8, 16], strides = [1, 1]} : vector<16x16xf32> to vector<8x16xf32>
    %cst_53 = arith.constant dense<0.000000e+00> : vector<8x8xf32>
    %49 = tpu.matmul %46, %47, %cst_53 {dimension_numbers = #tpu.dot_dimension_numbers<[1], [1], [0], [0], [0, 0, 1, 0], [], []>} : vector<8x16xf32>, vector<8x16xf32>, vector<8x8xf32> -> vector<8x8xf32>
    %cst_54 = arith.constant 2.500000e-01 : f32
    %50 = vector.broadcast %cst_54 : f32 to vector<8x8xf32>
    %51 = arith.mulf %49, %50 : vector<8x8xf32>
    %52 = arith.addf %51, %44 : vector<8x8xf32>
    %cst_55 = arith.constant dense<0xFF800000> : vector<8xf32>
    %53 = vector.multi_reduction <maximumf>, %52, %cst_55 [1] : vector<8x8xf32> to vector<8xf32>
    %54 = vector.shape_cast %53 : vector<8xf32> to vector<8x1xf32>
    %55 = vector.broadcast %54 : vector<8x1xf32> to vector<8x8xf32>
    %56 = arith.subf %52, %55 : vector<8x8xf32>
    %57 = math.exp %56 : vector<8x8xf32>
    %cst_56 = arith.constant dense<0.000000e+00> : vector<8xf32>
    %58 = vector.multi_reduction <add>, %57, %cst_56 [1] : vector<8x8xf32> to vector<8xf32>
    %59 = vector.shape_cast %58 : vector<8xf32> to vector<8x1xf32>
    %60 = vector.broadcast %59 : vector<8x1xf32> to vector<8x8xf32>
    %61 = arith.divf %57, %60 : vector<8x8xf32>
    %cst_57 = arith.constant dense<0.000000e+00> : vector<8x16xf32>
    %62 = tpu.matmul %61, %48, %cst_57 {dimension_numbers = #tpu.dot_dimension_numbers<[1], [0], [0], [1], [0, 0, 1, 1], [], []>} : vector<8x8xf32>, vector<8x16xf32>, vector<8x16xf32> -> vector<8x16xf32>
    %c0_58 = arith.constant 0 : index
    %c0_59 = arith.constant 0 : index
    %c0_60 = arith.constant 0 : index
    %c0_61 = arith.constant 0 : index
    %63 = vector.load %arg4[%c0_58, %c0_59, %c0_60, %c0_61] : memref<2x2x16x32xf32, #tpu.memory_space<vmem>>, vector<1x1x16x32xf32>
    %64 = vector.shape_cast %63 : vector<1x1x16x32xf32> to vector<16x32xf32>
    %cst_62 = arith.constant dense<0.000000e+00> : vector<8x32xf32>
    %65 = tpu.matmul %62, %64, %cst_62 {dimension_numbers = #tpu.dot_dimension_numbers<[1], [0], [0], [1], [0, 0, 1, 1], [], []>} : vector<8x16xf32>, vector<16x32xf32>, vector<8x32xf32> -> vector<8x32xf32>
    %66 = arith.addf %45, %65 : vector<8x32xf32>
    %67 = vector.extract_strided_slice %28 {offsets = [0, 0], sizes = [8, 16], strides = [1, 1]} : vector<16x16xf32> to vector<8x16xf32>
    %68 = vector.extract_strided_slice %35 {offsets = [0, 0], sizes = [8, 16], strides = [1, 1]} : vector<16x16xf32> to vector<8x16xf32>
    %69 = vector.extract_strided_slice %42 {offsets = [0, 0], sizes = [8, 16], strides = [1, 1]} : vector<16x16xf32> to vector<8x16xf32>
    %cst_63 = arith.constant dense<0.000000e+00> : vector<8x8xf32>
    %70 = tpu.matmul %67, %68, %cst_63 {dimension_numbers = #tpu.dot_dimension_numbers<[1], [1], [0], [0], [0, 0, 1, 0], [], []>} : vector<8x16xf32>, vector<8x16xf32>, vector<8x8xf32> -> vector<8x8xf32>
    %cst_64 = arith.constant 2.500000e-01 : f32
    %71 = vector.broadcast %cst_64 : f32 to vector<8x8xf32>
    %72 = arith.mulf %70, %71 : vector<8x8xf32>
    %73 = arith.addf %72, %44 : vector<8x8xf32>
    %cst_65 = arith.constant dense<0xFF800000> : vector<8xf32>
    %74 = vector.multi_reduction <maximumf>, %73, %cst_65 [1] : vector<8x8xf32> to vector<8xf32>
    %75 = vector.shape_cast %74 : vector<8xf32> to vector<8x1xf32>
    %76 = vector.broadcast %75 : vector<8x1xf32> to vector<8x8xf32>
    %77 = arith.subf %73, %76 : vector<8x8xf32>
    %78 = math.exp %77 : vector<8x8xf32>
    %cst_66 = arith.constant dense<0.000000e+00> : vector<8xf32>
    %79 = vector.multi_reduction <add>, %78, %cst_66 [1] : vector<8x8xf32> to vector<8xf32>
    %80 = vector.shape_cast %79 : vector<8xf32> to vector<8x1xf32>
    %81 = vector.broadcast %80 : vector<8x1xf32> to vector<8x8xf32>
    %82 = arith.divf %78, %81 : vector<8x8xf32>
    %cst_67 = arith.constant dense<0.000000e+00> : vector<8x16xf32>
    %83 = tpu.matmul %82, %69, %cst_67 {dimension_numbers = #tpu.dot_dimension_numbers<[1], [0], [0], [1], [0, 0, 1, 1], [], []>} : vector<8x8xf32>, vector<8x16xf32>, vector<8x16xf32> -> vector<8x16xf32>
    %c0_68 = arith.constant 0 : index
    %c1_69 = arith.constant 1 : index
    %c0_70 = arith.constant 0 : index
    %c0_71 = arith.constant 0 : index
    %84 = vector.load %arg4[%c0_68, %c1_69, %c0_70, %c0_71] : memref<2x2x16x32xf32, #tpu.memory_space<vmem>>, vector<1x1x16x32xf32>
    %85 = vector.shape_cast %84 : vector<1x1x16x32xf32> to vector<16x32xf32>
    %cst_72 = arith.constant dense<0.000000e+00> : vector<8x32xf32>
    %86 = tpu.matmul %83, %85, %cst_72 {dimension_numbers = #tpu.dot_dimension_numbers<[1], [0], [0], [1], [0, 0, 1, 1], [], []>} : vector<8x16xf32>, vector<16x32xf32>, vector<8x32xf32> -> vector<8x32xf32>
    %87 = arith.addf %66, %86 : vector<8x32xf32>
    %c1_73 = arith.constant 1 : index
    %c0_74 = arith.constant 0 : index
    %c0_75 = arith.constant 0 : index
    %88 = vector.load %arg1[%c1_73, %c0_74, %c0_75] : memref<2x8x8xf32, #tpu.memory_space<vmem>>, vector<1x8x8xf32>
    %89 = vector.shape_cast %88 : vector<1x8x8xf32> to vector<8x8xf32>
    %cst_76 = arith.constant 0.000000e+00 : f32
    %90 = vector.broadcast %cst_76 : f32 to vector<8x32xf32>
    %91 = vector.extract_strided_slice %7 {offsets = [8, 0], sizes = [8, 16], strides = [1, 1]} : vector<16x16xf32> to vector<8x16xf32>
    %92 = vector.extract_strided_slice %14 {offsets = [8, 0], sizes = [8, 16], strides = [1, 1]} : vector<16x16xf32> to vector<8x16xf32>
    %93 = vector.extract_strided_slice %21 {offsets = [8, 0], sizes = [8, 16], strides = [1, 1]} : vector<16x16xf32> to vector<8x16xf32>
    %cst_77 = arith.constant dense<0.000000e+00> : vector<8x8xf32>
    %94 = tpu.matmul %91, %92, %cst_77 {dimension_numbers = #tpu.dot_dimension_numbers<[1], [1], [0], [0], [0, 0, 1, 0], [], []>} : vector<8x16xf32>, vector<8x16xf32>, vector<8x8xf32> -> vector<8x8xf32>
    %cst_78 = arith.constant 2.500000e-01 : f32
    %95 = vector.broadcast %cst_78 : f32 to vector<8x8xf32>
    %96 = arith.mulf %94, %95 : vector<8x8xf32>
    %97 = arith.addf %96, %89 : vector<8x8xf32>
    %cst_79 = arith.constant dense<0xFF800000> : vector<8xf32>
    %98 = vector.multi_reduction <maximumf>, %97, %cst_79 [1] : vector<8x8xf32> to vector<8xf32>
    %99 = vector.shape_cast %98 : vector<8xf32> to vector<8x1xf32>
    %100 = vector.broadcast %99 : vector<8x1xf32> to vector<8x8xf32>
    %101 = arith.subf %97, %100 : vector<8x8xf32>
    %102 = math.exp %101 : vector<8x8xf32>
    %cst_80 = arith.constant dense<0.000000e+00> : vector<8xf32>
    %103 = vector.multi_reduction <add>, %102, %cst_80 [1] : vector<8x8xf32> to vector<8xf32>
    %104 = vector.shape_cast %103 : vector<8xf32> to vector<8x1xf32>
    %105 = vector.broadcast %104 : vector<8x1xf32> to vector<8x8xf32>
    %106 = arith.divf %102, %105 : vector<8x8xf32>
    %cst_81 = arith.constant dense<0.000000e+00> : vector<8x16xf32>
    %107 = tpu.matmul %106, %93, %cst_81 {dimension_numbers = #tpu.dot_dimension_numbers<[1], [0], [0], [1], [0, 0, 1, 1], [], []>} : vector<8x8xf32>, vector<8x16xf32>, vector<8x16xf32> -> vector<8x16xf32>
    %c0_82 = arith.constant 0 : index
    %c0_83 = arith.constant 0 : index
    %c0_84 = arith.constant 0 : index
    %c0_85 = arith.constant 0 : index
    %108 = vector.load %arg4[%c0_82, %c0_83, %c0_84, %c0_85] : memref<2x2x16x32xf32, #tpu.memory_space<vmem>>, vector<1x1x16x32xf32>
    %109 = vector.shape_cast %108 : vector<1x1x16x32xf32> to vector<16x32xf32>
    %cst_86 = arith.constant dense<0.000000e+00> : vector<8x32xf32>
    %110 = tpu.matmul %107, %109, %cst_86 {dimension_numbers = #tpu.dot_dimension_numbers<[1], [0], [0], [1], [0, 0, 1, 1], [], []>} : vector<8x16xf32>, vector<16x32xf32>, vector<8x32xf32> -> vector<8x32xf32>
    %111 = arith.addf %90, %110 : vector<8x32xf32>
    %112 = vector.extract_strided_slice %28 {offsets = [8, 0], sizes = [8, 16], strides = [1, 1]} : vector<16x16xf32> to vector<8x16xf32>
    %113 = vector.extract_strided_slice %35 {offsets = [8, 0], sizes = [8, 16], strides = [1, 1]} : vector<16x16xf32> to vector<8x16xf32>
    %114 = vector.extract_strided_slice %42 {offsets = [8, 0], sizes = [8, 16], strides = [1, 1]} : vector<16x16xf32> to vector<8x16xf32>
    %cst_87 = arith.constant dense<0.000000e+00> : vector<8x8xf32>
    %115 = tpu.matmul %112, %113, %cst_87 {dimension_numbers = #tpu.dot_dimension_numbers<[1], [1], [0], [0], [0, 0, 1, 0], [], []>} : vector<8x16xf32>, vector<8x16xf32>, vector<8x8xf32> -> vector<8x8xf32>
    %cst_88 = arith.constant 2.500000e-01 : f32
    %116 = vector.broadcast %cst_88 : f32 to vector<8x8xf32>
    %117 = arith.mulf %115, %116 : vector<8x8xf32>
    %118 = arith.addf %117, %89 : vector<8x8xf32>
    %cst_89 = arith.constant dense<0xFF800000> : vector<8xf32>
    %119 = vector.multi_reduction <maximumf>, %118, %cst_89 [1] : vector<8x8xf32> to vector<8xf32>
    %120 = vector.shape_cast %119 : vector<8xf32> to vector<8x1xf32>
    %121 = vector.broadcast %120 : vector<8x1xf32> to vector<8x8xf32>
    %122 = arith.subf %118, %121 : vector<8x8xf32>
    %123 = math.exp %122 : vector<8x8xf32>
    %cst_90 = arith.constant dense<0.000000e+00> : vector<8xf32>
    %124 = vector.multi_reduction <add>, %123, %cst_90 [1] : vector<8x8xf32> to vector<8xf32>
    %125 = vector.shape_cast %124 : vector<8xf32> to vector<8x1xf32>
    %126 = vector.broadcast %125 : vector<8x1xf32> to vector<8x8xf32>
    %127 = arith.divf %123, %126 : vector<8x8xf32>
    %cst_91 = arith.constant dense<0.000000e+00> : vector<8x16xf32>
    %128 = tpu.matmul %127, %114, %cst_91 {dimension_numbers = #tpu.dot_dimension_numbers<[1], [0], [0], [1], [0, 0, 1, 1], [], []>} : vector<8x8xf32>, vector<8x16xf32>, vector<8x16xf32> -> vector<8x16xf32>
    %c0_92 = arith.constant 0 : index
    %c1_93 = arith.constant 1 : index
    %c0_94 = arith.constant 0 : index
    %c0_95 = arith.constant 0 : index
    %129 = vector.load %arg4[%c0_92, %c1_93, %c0_94, %c0_95] : memref<2x2x16x32xf32, #tpu.memory_space<vmem>>, vector<1x1x16x32xf32>
    %130 = vector.shape_cast %129 : vector<1x1x16x32xf32> to vector<16x32xf32>
    %cst_96 = arith.constant dense<0.000000e+00> : vector<8x32xf32>
    %131 = tpu.matmul %128, %130, %cst_96 {dimension_numbers = #tpu.dot_dimension_numbers<[1], [0], [0], [1], [0, 0, 1, 1], [], []>} : vector<8x16xf32>, vector<16x32xf32>, vector<8x32xf32> -> vector<8x32xf32>
    %132 = arith.addf %111, %131 : vector<8x32xf32>
    %133 = tpu.concatenate %87, %132 in 0 : vector<8x32xf32>, vector<8x32xf32> -> vector<16x32xf32>
    %c0_97 = arith.constant 0 : index
    %c0_98 = arith.constant 0 : index
    %c0_99 = arith.constant 0 : index
    %c0_100 = arith.constant 0 : index
    %134 = vector.load %arg8[%c0_97, %c0_98, %c0_99, %c0_100] : memref<2x6x1x32xf32, #tpu.memory_space<vmem>>, vector<1x1x1x32xf32>
    %135 = vector.shape_cast %134 : vector<1x1x1x32xf32> to vector<1x32xf32>
    %136 = vector.broadcast %135 : vector<1x32xf32> to vector<16x32xf32>
    %137 = arith.addf %133, %136 : vector<16x32xf32>
    %138 = arith.addf %137, %0 : vector<16x32xf32>
    %c0_101 = arith.constant 0 : index
    %c1_102 = arith.constant 1 : index
    %c0_103 = arith.constant 0 : index
    %c0_104 = arith.constant 0 : index
    %139 = vector.load %arg8[%c0_101, %c1_102, %c0_103, %c0_104] : memref<2x6x1x32xf32, #tpu.memory_space<vmem>>, vector<1x1x1x32xf32>
    %140 = vector.shape_cast %139 : vector<1x1x1x32xf32> to vector<1x32xf32>
    %c0_105 = arith.constant 0 : index
    %c2_106 = arith.constant 2 : index
    %c0_107 = arith.constant 0 : index
    %c0_108 = arith.constant 0 : index
    %141 = vector.load %arg8[%c0_105, %c2_106, %c0_107, %c0_108] : memref<2x6x1x32xf32, #tpu.memory_space<vmem>>, vector<1x1x1x32xf32>
    %142 = vector.shape_cast %141 : vector<1x1x1x32xf32> to vector<1x32xf32>
    %cst_109 = arith.constant dense<0.000000e+00> : vector<16xf32>
    %143 = vector.multi_reduction <add>, %138, %cst_109 [1] : vector<16x32xf32> to vector<16xf32>
    %144 = vector.shape_cast %143 : vector<16xf32> to vector<16x1xf32>
    %cst_110 = arith.constant 3.200000e+01 : f32
    %145 = vector.broadcast %cst_110 : f32 to vector<16x1xf32>
    %146 = arith.divf %144, %145 : vector<16x1xf32>
    %147 = vector.broadcast %146 : vector<16x1xf32> to vector<16x32xf32>
    %148 = arith.subf %138, %147 : vector<16x32xf32>
    %149 = arith.mulf %148, %148 : vector<16x32xf32>
    %cst_111 = arith.constant dense<0.000000e+00> : vector<16xf32>
    %150 = vector.multi_reduction <add>, %149, %cst_111 [1] : vector<16x32xf32> to vector<16xf32>
    %151 = vector.shape_cast %150 : vector<16xf32> to vector<16x1xf32>
    %cst_112 = arith.constant 3.200000e+01 : f32
    %152 = vector.broadcast %cst_112 : f32 to vector<16x1xf32>
    %153 = arith.divf %151, %152 : vector<16x1xf32>
    %154 = vector.broadcast %146 : vector<16x1xf32> to vector<16x32xf32>
    %155 = arith.subf %138, %154 : vector<16x32xf32>
    %cst_113 = arith.constant 9.99999996E-13 : f32
    %156 = vector.broadcast %cst_113 : f32 to vector<16x1xf32>
    %157 = arith.addf %153, %156 : vector<16x1xf32>
    %158 = math.rsqrt %157 : vector<16x1xf32>
    %159 = vector.broadcast %158 : vector<16x1xf32> to vector<16x32xf32>
    %160 = arith.mulf %155, %159 : vector<16x32xf32>
    %161 = vector.broadcast %140 : vector<1x32xf32> to vector<16x32xf32>
    %162 = arith.mulf %161, %160 : vector<16x32xf32>
    %163 = vector.broadcast %142 : vector<1x32xf32> to vector<16x32xf32>
    %164 = arith.addf %162, %163 : vector<16x32xf32>
    %c0_114 = arith.constant 0 : index
    %c0_115 = arith.constant 0 : index
    %c0_116 = arith.constant 0 : index
    %165 = vector.load %arg5[%c0_114, %c0_115, %c0_116] : memref<2x32x128xf32, #tpu.memory_space<vmem>>, vector<1x32x128xf32>
    %166 = vector.shape_cast %165 : vector<1x32x128xf32> to vector<32x128xf32>
    %cst_117 = arith.constant dense<0.000000e+00> : vector<16x128xf32>
    %167 = tpu.matmul %164, %166, %cst_117 {dimension_numbers = #tpu.dot_dimension_numbers<[1], [0], [0], [1], [0, 0, 1, 1], [], []>} : vector<16x32xf32>, vector<32x128xf32>, vector<16x128xf32> -> vector<16x128xf32>
    %c0_118 = arith.constant 0 : index
    %c0_119 = arith.constant 0 : index
    %c0_120 = arith.constant 0 : index
    %168 = vector.load %arg6[%c0_118, %c0_119, %c0_120] : memref<2x1x128xf32, #tpu.memory_space<vmem>>, vector<1x1x128xf32>
    %169 = vector.shape_cast %168 : vector<1x1x128xf32> to vector<1x128xf32>
    %170 = vector.broadcast %169 : vector<1x128xf32> to vector<16x128xf32>
    %171 = arith.addf %167, %170 : vector<16x128xf32>
    %cst_121 = arith.constant 5.000000e-01 : f32
    %172 = vector.broadcast %cst_121 : f32 to vector<16x128xf32>
    %173 = arith.mulf %171, %172 : vector<16x128xf32>
    %cst_122 = arith.constant 1.41421354 : f32
    %174 = vector.broadcast %cst_122 : f32 to vector<16x128xf32>
    %175 = arith.divf %171, %174 : vector<16x128xf32>
    %cst_123 = arith.constant 0.000000e+00 : f32
    %176 = vector.broadcast %cst_123 : f32 to vector<16x128xf32>
    %177 = arith.cmpf oge, %175, %176 : vector<16x128xf32>
    %cst_124 = arith.constant 1.000000e+00 : f32
    %cst_125 = arith.constant -1.000000e+00 : f32
    %178 = vector.broadcast %cst_124 : f32 to vector<16x128xf32>
    %179 = vector.broadcast %cst_125 : f32 to vector<16x128xf32>
    %180 = arith.select %177, %178, %179 : vector<16x128xi1>, vector<16x128xf32>
    %181 = math.absf %175 : vector<16x128xf32>
    %cst_126 = arith.constant 0.327591091 : f32
    %182 = vector.broadcast %cst_126 : f32 to vector<16x128xf32>
    %183 = arith.mulf %182, %181 : vector<16x128xf32>
    %cst_127 = arith.constant 1.000000e+00 : f32
    %184 = vector.broadcast %cst_127 : f32 to vector<16x128xf32>
    %185 = arith.addf %184, %183 : vector<16x128xf32>
    %cst_128 = arith.constant 1.000000e+00 : f32
    %186 = vector.broadcast %cst_128 : f32 to vector<16x128xf32>
    %187 = arith.divf %186, %185 : vector<16x128xf32>
    %cst_129 = arith.constant 1.06140542 : f32
    %188 = vector.broadcast %cst_129 : f32 to vector<16x128xf32>
    %189 = arith.mulf %188, %187 : vector<16x128xf32>
    %cst_130 = arith.constant -1.45315206 : f32
    %190 = vector.broadcast %cst_130 : f32 to vector<16x128xf32>
    %191 = arith.addf %189, %190 : vector<16x128xf32>
    %192 = arith.mulf %191, %187 : vector<16x128xf32>
    %cst_131 = arith.constant 1.42141378 : f32
    %193 = vector.broadcast %cst_131 : f32 to vector<16x128xf32>
    %194 = arith.addf %192, %193 : vector<16x128xf32>
    %195 = arith.mulf %194, %187 : vector<16x128xf32>
    %cst_132 = arith.constant -0.284496725 : f32
    %196 = vector.broadcast %cst_132 : f32 to vector<16x128xf32>
    %197 = arith.addf %195, %196 : vector<16x128xf32>
    %198 = arith.mulf %197, %187 : vector<16x128xf32>
    %cst_133 = arith.constant 0.254829586 : f32
    %199 = vector.broadcast %cst_133 : f32 to vector<16x128xf32>
    %200 = arith.addf %198, %199 : vector<16x128xf32>
    %201 = arith.mulf %200, %187 : vector<16x128xf32>
    %cst_134 = arith.constant 0.000000e+00 : f32
    %202 = vector.broadcast %cst_134 : f32 to vector<16x128xf32>
    %203 = arith.subf %202, %181 : vector<16x128xf32>
    %204 = arith.mulf %203, %181 : vector<16x128xf32>
    %205 = math.exp %204 : vector<16x128xf32>
    %206 = arith.mulf %201, %205 : vector<16x128xf32>
    %cst_135 = arith.constant 1.000000e+00 : f32
    %207 = vector.broadcast %cst_135 : f32 to vector<16x128xf32>
    %208 = arith.subf %207, %206 : vector<16x128xf32>
    %209 = arith.mulf %180, %208 : vector<16x128xf32>
    %cst_136 = arith.constant 1.000000e+00 : f32
    %210 = vector.broadcast %cst_136 : f32 to vector<16x128xf32>
    %211 = arith.addf %210, %209 : vector<16x128xf32>
    %212 = arith.mulf %173, %211 : vector<16x128xf32>
    %c0_137 = arith.constant 0 : index
    %c0_138 = arith.constant 0 : index
    %c0_139 = arith.constant 0 : index
    %213 = vector.load %arg7[%c0_137, %c0_138, %c0_139] : memref<2x128x32xf32, #tpu.memory_space<vmem>>, vector<1x128x32xf32>
    %214 = vector.shape_cast %213 : vector<1x128x32xf32> to vector<128x32xf32>
    %cst_140 = arith.constant dense<0.000000e+00> : vector<16x32xf32>
    %215 = tpu.matmul %212, %214, %cst_140 {dimension_numbers = #tpu.dot_dimension_numbers<[1], [0], [0], [1], [0, 0, 1, 1], [], []>} : vector<16x128xf32>, vector<128x32xf32>, vector<16x32xf32> -> vector<16x32xf32>
    %c0_141 = arith.constant 0 : index
    %c3_142 = arith.constant 3 : index
    %c0_143 = arith.constant 0 : index
    %c0_144 = arith.constant 0 : index
    %216 = vector.load %arg8[%c0_141, %c3_142, %c0_143, %c0_144] : memref<2x6x1x32xf32, #tpu.memory_space<vmem>>, vector<1x1x1x32xf32>
    %217 = vector.shape_cast %216 : vector<1x1x1x32xf32> to vector<1x32xf32>
    %218 = vector.broadcast %217 : vector<1x32xf32> to vector<16x32xf32>
    %219 = arith.addf %215, %218 : vector<16x32xf32>
    %220 = arith.addf %219, %164 : vector<16x32xf32>
    %c0_145 = arith.constant 0 : index
    %c4_146 = arith.constant 4 : index
    %c0_147 = arith.constant 0 : index
    %c0_148 = arith.constant 0 : index
    %221 = vector.load %arg8[%c0_145, %c4_146, %c0_147, %c0_148] : memref<2x6x1x32xf32, #tpu.memory_space<vmem>>, vector<1x1x1x32xf32>
    %222 = vector.shape_cast %221 : vector<1x1x1x32xf32> to vector<1x32xf32>
    %c0_149 = arith.constant 0 : index
    %c5_150 = arith.constant 5 : index
    %c0_151 = arith.constant 0 : index
    %c0_152 = arith.constant 0 : index
    %223 = vector.load %arg8[%c0_149, %c5_150, %c0_151, %c0_152] : memref<2x6x1x32xf32, #tpu.memory_space<vmem>>, vector<1x1x1x32xf32>
    %224 = vector.shape_cast %223 : vector<1x1x1x32xf32> to vector<1x32xf32>
    %cst_153 = arith.constant dense<0.000000e+00> : vector<16xf32>
    %225 = vector.multi_reduction <add>, %220, %cst_153 [1] : vector<16x32xf32> to vector<16xf32>
    %226 = vector.shape_cast %225 : vector<16xf32> to vector<16x1xf32>
    %cst_154 = arith.constant 3.200000e+01 : f32
    %227 = vector.broadcast %cst_154 : f32 to vector<16x1xf32>
    %228 = arith.divf %226, %227 : vector<16x1xf32>
    %229 = vector.broadcast %228 : vector<16x1xf32> to vector<16x32xf32>
    %230 = arith.subf %220, %229 : vector<16x32xf32>
    %231 = arith.mulf %230, %230 : vector<16x32xf32>
    %cst_155 = arith.constant dense<0.000000e+00> : vector<16xf32>
    %232 = vector.multi_reduction <add>, %231, %cst_155 [1] : vector<16x32xf32> to vector<16xf32>
    %233 = vector.shape_cast %232 : vector<16xf32> to vector<16x1xf32>
    %cst_156 = arith.constant 3.200000e+01 : f32
    %234 = vector.broadcast %cst_156 : f32 to vector<16x1xf32>
    %235 = arith.divf %233, %234 : vector<16x1xf32>
    %236 = vector.broadcast %228 : vector<16x1xf32> to vector<16x32xf32>
    %237 = arith.subf %220, %236 : vector<16x32xf32>
    %cst_157 = arith.constant 9.99999996E-13 : f32
    %238 = vector.broadcast %cst_157 : f32 to vector<16x1xf32>
    %239 = arith.addf %235, %238 : vector<16x1xf32>
    %240 = math.rsqrt %239 : vector<16x1xf32>
    %241 = vector.broadcast %240 : vector<16x1xf32> to vector<16x32xf32>
    %242 = arith.mulf %237, %241 : vector<16x32xf32>
    %243 = vector.broadcast %222 : vector<1x32xf32> to vector<16x32xf32>
    %244 = arith.mulf %243, %242 : vector<16x32xf32>
    %245 = vector.broadcast %224 : vector<1x32xf32> to vector<16x32xf32>
    %246 = arith.addf %244, %245 : vector<16x32xf32>
    %c1_158 = arith.constant 1 : index
    %c0_159 = arith.constant 0 : index
    %c0_160 = arith.constant 0 : index
    %c0_161 = arith.constant 0 : index
    %247 = vector.load %arg2[%c1_158, %c0_159, %c0_160, %c0_161] : memref<2x6x32x16xf32, #tpu.memory_space<vmem>>, vector<1x1x32x16xf32>
    %248 = vector.shape_cast %247 : vector<1x1x32x16xf32> to vector<32x16xf32>
    %cst_162 = arith.constant dense<0.000000e+00> : vector<16x16xf32>
    %249 = tpu.matmul %246, %248, %cst_162 {dimension_numbers = #tpu.dot_dimension_numbers<[1], [0], [0], [1], [0, 0, 1, 1], [], []>} : vector<16x32xf32>, vector<32x16xf32>, vector<16x16xf32> -> vector<16x16xf32>
    %c1_163 = arith.constant 1 : index
    %c0_164 = arith.constant 0 : index
    %c0_165 = arith.constant 0 : index
    %c0_166 = arith.constant 0 : index
    %250 = vector.load %arg3[%c1_163, %c0_164, %c0_165, %c0_166] : memref<2x6x1x16xf32, #tpu.memory_space<vmem>>, vector<1x1x1x16xf32>
    %251 = vector.shape_cast %250 : vector<1x1x1x16xf32> to vector<1x16xf32>
    %252 = vector.broadcast %251 : vector<1x16xf32> to vector<16x16xf32>
    %253 = arith.addf %249, %252 : vector<16x16xf32>
    %c1_167 = arith.constant 1 : index
    %c1_168 = arith.constant 1 : index
    %c0_169 = arith.constant 0 : index
    %c0_170 = arith.constant 0 : index
    %254 = vector.load %arg2[%c1_167, %c1_168, %c0_169, %c0_170] : memref<2x6x32x16xf32, #tpu.memory_space<vmem>>, vector<1x1x32x16xf32>
    %255 = vector.shape_cast %254 : vector<1x1x32x16xf32> to vector<32x16xf32>
    %cst_171 = arith.constant dense<0.000000e+00> : vector<16x16xf32>
    %256 = tpu.matmul %246, %255, %cst_171 {dimension_numbers = #tpu.dot_dimension_numbers<[1], [0], [0], [1], [0, 0, 1, 1], [], []>} : vector<16x32xf32>, vector<32x16xf32>, vector<16x16xf32> -> vector<16x16xf32>
    %c1_172 = arith.constant 1 : index
    %c1_173 = arith.constant 1 : index
    %c0_174 = arith.constant 0 : index
    %c0_175 = arith.constant 0 : index
    %257 = vector.load %arg3[%c1_172, %c1_173, %c0_174, %c0_175] : memref<2x6x1x16xf32, #tpu.memory_space<vmem>>, vector<1x1x1x16xf32>
    %258 = vector.shape_cast %257 : vector<1x1x1x16xf32> to vector<1x16xf32>
    %259 = vector.broadcast %258 : vector<1x16xf32> to vector<16x16xf32>
    %260 = arith.addf %256, %259 : vector<16x16xf32>
    %c1_176 = arith.constant 1 : index
    %c2_177 = arith.constant 2 : index
    %c0_178 = arith.constant 0 : index
    %c0_179 = arith.constant 0 : index
    %261 = vector.load %arg2[%c1_176, %c2_177, %c0_178, %c0_179] : memref<2x6x32x16xf32, #tpu.memory_space<vmem>>, vector<1x1x32x16xf32>
    %262 = vector.shape_cast %261 : vector<1x1x32x16xf32> to vector<32x16xf32>
    %cst_180 = arith.constant dense<0.000000e+00> : vector<16x16xf32>
    %263 = tpu.matmul %246, %262, %cst_180 {dimension_numbers = #tpu.dot_dimension_numbers<[1], [0], [0], [1], [0, 0, 1, 1], [], []>} : vector<16x32xf32>, vector<32x16xf32>, vector<16x16xf32> -> vector<16x16xf32>
    %c1_181 = arith.constant 1 : index
    %c2_182 = arith.constant 2 : index
    %c0_183 = arith.constant 0 : index
    %c0_184 = arith.constant 0 : index
    %264 = vector.load %arg3[%c1_181, %c2_182, %c0_183, %c0_184] : memref<2x6x1x16xf32, #tpu.memory_space<vmem>>, vector<1x1x1x16xf32>
    %265 = vector.shape_cast %264 : vector<1x1x1x16xf32> to vector<1x16xf32>
    %266 = vector.broadcast %265 : vector<1x16xf32> to vector<16x16xf32>
    %267 = arith.addf %263, %266 : vector<16x16xf32>
    %c1_185 = arith.constant 1 : index
    %c3_186 = arith.constant 3 : index
    %c0_187 = arith.constant 0 : index
    %c0_188 = arith.constant 0 : index
    %268 = vector.load %arg2[%c1_185, %c3_186, %c0_187, %c0_188] : memref<2x6x32x16xf32, #tpu.memory_space<vmem>>, vector<1x1x32x16xf32>
    %269 = vector.shape_cast %268 : vector<1x1x32x16xf32> to vector<32x16xf32>
    %cst_189 = arith.constant dense<0.000000e+00> : vector<16x16xf32>
    %270 = tpu.matmul %246, %269, %cst_189 {dimension_numbers = #tpu.dot_dimension_numbers<[1], [0], [0], [1], [0, 0, 1, 1], [], []>} : vector<16x32xf32>, vector<32x16xf32>, vector<16x16xf32> -> vector<16x16xf32>
    %c1_190 = arith.constant 1 : index
    %c3_191 = arith.constant 3 : index
    %c0_192 = arith.constant 0 : index
    %c0_193 = arith.constant 0 : index
    %271 = vector.load %arg3[%c1_190, %c3_191, %c0_192, %c0_193] : memref<2x6x1x16xf32, #tpu.memory_space<vmem>>, vector<1x1x1x16xf32>
    %272 = vector.shape_cast %271 : vector<1x1x1x16xf32> to vector<1x16xf32>
    %273 = vector.broadcast %272 : vector<1x16xf32> to vector<16x16xf32>
    %274 = arith.addf %270, %273 : vector<16x16xf32>
    %c1_194 = arith.constant 1 : index
    %c4_195 = arith.constant 4 : index
    %c0_196 = arith.constant 0 : index
    %c0_197 = arith.constant 0 : index
    %275 = vector.load %arg2[%c1_194, %c4_195, %c0_196, %c0_197] : memref<2x6x32x16xf32, #tpu.memory_space<vmem>>, vector<1x1x32x16xf32>
    %276 = vector.shape_cast %275 : vector<1x1x32x16xf32> to vector<32x16xf32>
    %cst_198 = arith.constant dense<0.000000e+00> : vector<16x16xf32>
    %277 = tpu.matmul %246, %276, %cst_198 {dimension_numbers = #tpu.dot_dimension_numbers<[1], [0], [0], [1], [0, 0, 1, 1], [], []>} : vector<16x32xf32>, vector<32x16xf32>, vector<16x16xf32> -> vector<16x16xf32>
    %c1_199 = arith.constant 1 : index
    %c4_200 = arith.constant 4 : index
    %c0_201 = arith.constant 0 : index
    %c0_202 = arith.constant 0 : index
    %278 = vector.load %arg3[%c1_199, %c4_200, %c0_201, %c0_202] : memref<2x6x1x16xf32, #tpu.memory_space<vmem>>, vector<1x1x1x16xf32>
    %279 = vector.shape_cast %278 : vector<1x1x1x16xf32> to vector<1x16xf32>
    %280 = vector.broadcast %279 : vector<1x16xf32> to vector<16x16xf32>
    %281 = arith.addf %277, %280 : vector<16x16xf32>
    %c1_203 = arith.constant 1 : index
    %c5_204 = arith.constant 5 : index
    %c0_205 = arith.constant 0 : index
    %c0_206 = arith.constant 0 : index
    %282 = vector.load %arg2[%c1_203, %c5_204, %c0_205, %c0_206] : memref<2x6x32x16xf32, #tpu.memory_space<vmem>>, vector<1x1x32x16xf32>
    %283 = vector.shape_cast %282 : vector<1x1x32x16xf32> to vector<32x16xf32>
    %cst_207 = arith.constant dense<0.000000e+00> : vector<16x16xf32>
    %284 = tpu.matmul %246, %283, %cst_207 {dimension_numbers = #tpu.dot_dimension_numbers<[1], [0], [0], [1], [0, 0, 1, 1], [], []>} : vector<16x32xf32>, vector<32x16xf32>, vector<16x16xf32> -> vector<16x16xf32>
    %c1_208 = arith.constant 1 : index
    %c5_209 = arith.constant 5 : index
    %c0_210 = arith.constant 0 : index
    %c0_211 = arith.constant 0 : index
    %285 = vector.load %arg3[%c1_208, %c5_209, %c0_210, %c0_211] : memref<2x6x1x16xf32, #tpu.memory_space<vmem>>, vector<1x1x1x16xf32>
    %286 = vector.shape_cast %285 : vector<1x1x1x16xf32> to vector<1x16xf32>
    %287 = vector.broadcast %286 : vector<1x16xf32> to vector<16x16xf32>
    %288 = arith.addf %284, %287 : vector<16x16xf32>
    %c0_212 = arith.constant 0 : index
    %c0_213 = arith.constant 0 : index
    %c0_214 = arith.constant 0 : index
    %289 = vector.load %arg1[%c0_212, %c0_213, %c0_214] : memref<2x8x8xf32, #tpu.memory_space<vmem>>, vector<1x8x8xf32>
    %290 = vector.shape_cast %289 : vector<1x8x8xf32> to vector<8x8xf32>
    %cst_215 = arith.constant 0.000000e+00 : f32
    %291 = vector.broadcast %cst_215 : f32 to vector<8x32xf32>
    %292 = vector.extract_strided_slice %253 {offsets = [0, 0], sizes = [8, 16], strides = [1, 1]} : vector<16x16xf32> to vector<8x16xf32>
    %293 = vector.extract_strided_slice %260 {offsets = [0, 0], sizes = [8, 16], strides = [1, 1]} : vector<16x16xf32> to vector<8x16xf32>
    %294 = vector.extract_strided_slice %267 {offsets = [0, 0], sizes = [8, 16], strides = [1, 1]} : vector<16x16xf32> to vector<8x16xf32>
    %cst_216 = arith.constant dense<0.000000e+00> : vector<8x8xf32>
    %295 = tpu.matmul %292, %293, %cst_216 {dimension_numbers = #tpu.dot_dimension_numbers<[1], [1], [0], [0], [0, 0, 1, 0], [], []>} : vector<8x16xf32>, vector<8x16xf32>, vector<8x8xf32> -> vector<8x8xf32>
    %cst_217 = arith.constant 2.500000e-01 : f32
    %296 = vector.broadcast %cst_217 : f32 to vector<8x8xf32>
    %297 = arith.mulf %295, %296 : vector<8x8xf32>
    %298 = arith.addf %297, %290 : vector<8x8xf32>
    %cst_218 = arith.constant dense<0xFF800000> : vector<8xf32>
    %299 = vector.multi_reduction <maximumf>, %298, %cst_218 [1] : vector<8x8xf32> to vector<8xf32>
    %300 = vector.shape_cast %299 : vector<8xf32> to vector<8x1xf32>
    %301 = vector.broadcast %300 : vector<8x1xf32> to vector<8x8xf32>
    %302 = arith.subf %298, %301 : vector<8x8xf32>
    %303 = math.exp %302 : vector<8x8xf32>
    %cst_219 = arith.constant dense<0.000000e+00> : vector<8xf32>
    %304 = vector.multi_reduction <add>, %303, %cst_219 [1] : vector<8x8xf32> to vector<8xf32>
    %305 = vector.shape_cast %304 : vector<8xf32> to vector<8x1xf32>
    %306 = vector.broadcast %305 : vector<8x1xf32> to vector<8x8xf32>
    %307 = arith.divf %303, %306 : vector<8x8xf32>
    %cst_220 = arith.constant dense<0.000000e+00> : vector<8x16xf32>
    %308 = tpu.matmul %307, %294, %cst_220 {dimension_numbers = #tpu.dot_dimension_numbers<[1], [0], [0], [1], [0, 0, 1, 1], [], []>} : vector<8x8xf32>, vector<8x16xf32>, vector<8x16xf32> -> vector<8x16xf32>
    %c1_221 = arith.constant 1 : index
    %c0_222 = arith.constant 0 : index
    %c0_223 = arith.constant 0 : index
    %c0_224 = arith.constant 0 : index
    %309 = vector.load %arg4[%c1_221, %c0_222, %c0_223, %c0_224] : memref<2x2x16x32xf32, #tpu.memory_space<vmem>>, vector<1x1x16x32xf32>
    %310 = vector.shape_cast %309 : vector<1x1x16x32xf32> to vector<16x32xf32>
    %cst_225 = arith.constant dense<0.000000e+00> : vector<8x32xf32>
    %311 = tpu.matmul %308, %310, %cst_225 {dimension_numbers = #tpu.dot_dimension_numbers<[1], [0], [0], [1], [0, 0, 1, 1], [], []>} : vector<8x16xf32>, vector<16x32xf32>, vector<8x32xf32> -> vector<8x32xf32>
    %312 = arith.addf %291, %311 : vector<8x32xf32>
    %313 = vector.extract_strided_slice %274 {offsets = [0, 0], sizes = [8, 16], strides = [1, 1]} : vector<16x16xf32> to vector<8x16xf32>
    %314 = vector.extract_strided_slice %281 {offsets = [0, 0], sizes = [8, 16], strides = [1, 1]} : vector<16x16xf32> to vector<8x16xf32>
    %315 = vector.extract_strided_slice %288 {offsets = [0, 0], sizes = [8, 16], strides = [1, 1]} : vector<16x16xf32> to vector<8x16xf32>
    %cst_226 = arith.constant dense<0.000000e+00> : vector<8x8xf32>
    %316 = tpu.matmul %313, %314, %cst_226 {dimension_numbers = #tpu.dot_dimension_numbers<[1], [1], [0], [0], [0, 0, 1, 0], [], []>} : vector<8x16xf32>, vector<8x16xf32>, vector<8x8xf32> -> vector<8x8xf32>
    %cst_227 = arith.constant 2.500000e-01 : f32
    %317 = vector.broadcast %cst_227 : f32 to vector<8x8xf32>
    %318 = arith.mulf %316, %317 : vector<8x8xf32>
    %319 = arith.addf %318, %290 : vector<8x8xf32>
    %cst_228 = arith.constant dense<0xFF800000> : vector<8xf32>
    %320 = vector.multi_reduction <maximumf>, %319, %cst_228 [1] : vector<8x8xf32> to vector<8xf32>
    %321 = vector.shape_cast %320 : vector<8xf32> to vector<8x1xf32>
    %322 = vector.broadcast %321 : vector<8x1xf32> to vector<8x8xf32>
    %323 = arith.subf %319, %322 : vector<8x8xf32>
    %324 = math.exp %323 : vector<8x8xf32>
    %cst_229 = arith.constant dense<0.000000e+00> : vector<8xf32>
    %325 = vector.multi_reduction <add>, %324, %cst_229 [1] : vector<8x8xf32> to vector<8xf32>
    %326 = vector.shape_cast %325 : vector<8xf32> to vector<8x1xf32>
    %327 = vector.broadcast %326 : vector<8x1xf32> to vector<8x8xf32>
    %328 = arith.divf %324, %327 : vector<8x8xf32>
    %cst_230 = arith.constant dense<0.000000e+00> : vector<8x16xf32>
    %329 = tpu.matmul %328, %315, %cst_230 {dimension_numbers = #tpu.dot_dimension_numbers<[1], [0], [0], [1], [0, 0, 1, 1], [], []>} : vector<8x8xf32>, vector<8x16xf32>, vector<8x16xf32> -> vector<8x16xf32>
    %c1_231 = arith.constant 1 : index
    %c1_232 = arith.constant 1 : index
    %c0_233 = arith.constant 0 : index
    %c0_234 = arith.constant 0 : index
    %330 = vector.load %arg4[%c1_231, %c1_232, %c0_233, %c0_234] : memref<2x2x16x32xf32, #tpu.memory_space<vmem>>, vector<1x1x16x32xf32>
    %331 = vector.shape_cast %330 : vector<1x1x16x32xf32> to vector<16x32xf32>
    %cst_235 = arith.constant dense<0.000000e+00> : vector<8x32xf32>
    %332 = tpu.matmul %329, %331, %cst_235 {dimension_numbers = #tpu.dot_dimension_numbers<[1], [0], [0], [1], [0, 0, 1, 1], [], []>} : vector<8x16xf32>, vector<16x32xf32>, vector<8x32xf32> -> vector<8x32xf32>
    %333 = arith.addf %312, %332 : vector<8x32xf32>
    %c1_236 = arith.constant 1 : index
    %c0_237 = arith.constant 0 : index
    %c0_238 = arith.constant 0 : index
    %334 = vector.load %arg1[%c1_236, %c0_237, %c0_238] : memref<2x8x8xf32, #tpu.memory_space<vmem>>, vector<1x8x8xf32>
    %335 = vector.shape_cast %334 : vector<1x8x8xf32> to vector<8x8xf32>
    %cst_239 = arith.constant 0.000000e+00 : f32
    %336 = vector.broadcast %cst_239 : f32 to vector<8x32xf32>
    %337 = vector.extract_strided_slice %253 {offsets = [8, 0], sizes = [8, 16], strides = [1, 1]} : vector<16x16xf32> to vector<8x16xf32>
    %338 = vector.extract_strided_slice %260 {offsets = [8, 0], sizes = [8, 16], strides = [1, 1]} : vector<16x16xf32> to vector<8x16xf32>
    %339 = vector.extract_strided_slice %267 {offsets = [8, 0], sizes = [8, 16], strides = [1, 1]} : vector<16x16xf32> to vector<8x16xf32>
    %cst_240 = arith.constant dense<0.000000e+00> : vector<8x8xf32>
    %340 = tpu.matmul %337, %338, %cst_240 {dimension_numbers = #tpu.dot_dimension_numbers<[1], [1], [0], [0], [0, 0, 1, 0], [], []>} : vector<8x16xf32>, vector<8x16xf32>, vector<8x8xf32> -> vector<8x8xf32>
    %cst_241 = arith.constant 2.500000e-01 : f32
    %341 = vector.broadcast %cst_241 : f32 to vector<8x8xf32>
    %342 = arith.mulf %340, %341 : vector<8x8xf32>
    %343 = arith.addf %342, %335 : vector<8x8xf32>
    %cst_242 = arith.constant dense<0xFF800000> : vector<8xf32>
    %344 = vector.multi_reduction <maximumf>, %343, %cst_242 [1] : vector<8x8xf32> to vector<8xf32>
    %345 = vector.shape_cast %344 : vector<8xf32> to vector<8x1xf32>
    %346 = vector.broadcast %345 : vector<8x1xf32> to vector<8x8xf32>
    %347 = arith.subf %343, %346 : vector<8x8xf32>
    %348 = math.exp %347 : vector<8x8xf32>
    %cst_243 = arith.constant dense<0.000000e+00> : vector<8xf32>
    %349 = vector.multi_reduction <add>, %348, %cst_243 [1] : vector<8x8xf32> to vector<8xf32>
    %350 = vector.shape_cast %349 : vector<8xf32> to vector<8x1xf32>
    %351 = vector.broadcast %350 : vector<8x1xf32> to vector<8x8xf32>
    %352 = arith.divf %348, %351 : vector<8x8xf32>
    %cst_244 = arith.constant dense<0.000000e+00> : vector<8x16xf32>
    %353 = tpu.matmul %352, %339, %cst_244 {dimension_numbers = #tpu.dot_dimension_numbers<[1], [0], [0], [1], [0, 0, 1, 1], [], []>} : vector<8x8xf32>, vector<8x16xf32>, vector<8x16xf32> -> vector<8x16xf32>
    %c1_245 = arith.constant 1 : index
    %c0_246 = arith.constant 0 : index
    %c0_247 = arith.constant 0 : index
    %c0_248 = arith.constant 0 : index
    %354 = vector.load %arg4[%c1_245, %c0_246, %c0_247, %c0_248] : memref<2x2x16x32xf32, #tpu.memory_space<vmem>>, vector<1x1x16x32xf32>
    %355 = vector.shape_cast %354 : vector<1x1x16x32xf32> to vector<16x32xf32>
    %cst_249 = arith.constant dense<0.000000e+00> : vector<8x32xf32>
    %356 = tpu.matmul %353, %355, %cst_249 {dimension_numbers = #tpu.dot_dimension_numbers<[1], [0], [0], [1], [0, 0, 1, 1], [], []>} : vector<8x16xf32>, vector<16x32xf32>, vector<8x32xf32> -> vector<8x32xf32>
    %357 = arith.addf %336, %356 : vector<8x32xf32>
    %358 = vector.extract_strided_slice %274 {offsets = [8, 0], sizes = [8, 16], strides = [1, 1]} : vector<16x16xf32> to vector<8x16xf32>
    %359 = vector.extract_strided_slice %281 {offsets = [8, 0], sizes = [8, 16], strides = [1, 1]} : vector<16x16xf32> to vector<8x16xf32>
    %360 = vector.extract_strided_slice %288 {offsets = [8, 0], sizes = [8, 16], strides = [1, 1]} : vector<16x16xf32> to vector<8x16xf32>
    %cst_250 = arith.constant dense<0.000000e+00> : vector<8x8xf32>
    %361 = tpu.matmul %358, %359, %cst_250 {dimension_numbers = #tpu.dot_dimension_numbers<[1], [1], [0], [0], [0, 0, 1, 0], [], []>} : vector<8x16xf32>, vector<8x16xf32>, vector<8x8xf32> -> vector<8x8xf32>
    %cst_251 = arith.constant 2.500000e-01 : f32
    %362 = vector.broadcast %cst_251 : f32 to vector<8x8xf32>
    %363 = arith.mulf %361, %362 : vector<8x8xf32>
    %364 = arith.addf %363, %335 : vector<8x8xf32>
    %cst_252 = arith.constant dense<0xFF800000> : vector<8xf32>
    %365 = vector.multi_reduction <maximumf>, %364, %cst_252 [1] : vector<8x8xf32> to vector<8xf32>
    %366 = vector.shape_cast %365 : vector<8xf32> to vector<8x1xf32>
    %367 = vector.broadcast %366 : vector<8x1xf32> to vector<8x8xf32>
    %368 = arith.subf %364, %367 : vector<8x8xf32>
    %369 = math.exp %368 : vector<8x8xf32>
    %cst_253 = arith.constant dense<0.000000e+00> : vector<8xf32>
    %370 = vector.multi_reduction <add>, %369, %cst_253 [1] : vector<8x8xf32> to vector<8xf32>
    %371 = vector.shape_cast %370 : vector<8xf32> to vector<8x1xf32>
    %372 = vector.broadcast %371 : vector<8x1xf32> to vector<8x8xf32>
    %373 = arith.divf %369, %372 : vector<8x8xf32>
    %cst_254 = arith.constant dense<0.000000e+00> : vector<8x16xf32>
    %374 = tpu.matmul %373, %360, %cst_254 {dimension_numbers = #tpu.dot_dimension_numbers<[1], [0], [0], [1], [0, 0, 1, 1], [], []>} : vector<8x8xf32>, vector<8x16xf32>, vector<8x16xf32> -> vector<8x16xf32>
    %c1_255 = arith.constant 1 : index
    %c1_256 = arith.constant 1 : index
    %c0_257 = arith.constant 0 : index
    %c0_258 = arith.constant 0 : index
    %375 = vector.load %arg4[%c1_255, %c1_256, %c0_257, %c0_258] : memref<2x2x16x32xf32, #tpu.memory_space<vmem>>, vector<1x1x16x32xf32>
    %376 = vector.shape_cast %375 : vector<1x1x16x32xf32> to vector<16x32xf32>
    %cst_259 = arith.constant dense<0.000000e+00> : vector<8x32xf32>
    %377 = tpu.matmul %374, %376, %cst_259 {dimension_numbers = #tpu.dot_dimension_numbers<[1], [0], [0], [1], [0, 0, 1, 1], [], []>} : vector<8x16xf32>, vector<16x32xf32>, vector<8x32xf32> -> vector<8x32xf32>
    %378 = arith.addf %357, %377 : vector<8x32xf32>
    %379 = tpu.concatenate %333, %378 in 0 : vector<8x32xf32>, vector<8x32xf32> -> vector<16x32xf32>
    %c1_260 = arith.constant 1 : index
    %c0_261 = arith.constant 0 : index
    %c0_262 = arith.constant 0 : index
    %c0_263 = arith.constant 0 : index
    %380 = vector.load %arg8[%c1_260, %c0_261, %c0_262, %c0_263] : memref<2x6x1x32xf32, #tpu.memory_space<vmem>>, vector<1x1x1x32xf32>
    %381 = vector.shape_cast %380 : vector<1x1x1x32xf32> to vector<1x32xf32>
    %382 = vector.broadcast %381 : vector<1x32xf32> to vector<16x32xf32>
    %383 = arith.addf %379, %382 : vector<16x32xf32>
    %384 = arith.addf %383, %246 : vector<16x32xf32>
    %c1_264 = arith.constant 1 : index
    %c1_265 = arith.constant 1 : index
    %c0_266 = arith.constant 0 : index
    %c0_267 = arith.constant 0 : index
    %385 = vector.load %arg8[%c1_264, %c1_265, %c0_266, %c0_267] : memref<2x6x1x32xf32, #tpu.memory_space<vmem>>, vector<1x1x1x32xf32>
    %386 = vector.shape_cast %385 : vector<1x1x1x32xf32> to vector<1x32xf32>
    %c1_268 = arith.constant 1 : index
    %c2_269 = arith.constant 2 : index
    %c0_270 = arith.constant 0 : index
    %c0_271 = arith.constant 0 : index
    %387 = vector.load %arg8[%c1_268, %c2_269, %c0_270, %c0_271] : memref<2x6x1x32xf32, #tpu.memory_space<vmem>>, vector<1x1x1x32xf32>
    %388 = vector.shape_cast %387 : vector<1x1x1x32xf32> to vector<1x32xf32>
    %cst_272 = arith.constant dense<0.000000e+00> : vector<16xf32>
    %389 = vector.multi_reduction <add>, %384, %cst_272 [1] : vector<16x32xf32> to vector<16xf32>
    %390 = vector.shape_cast %389 : vector<16xf32> to vector<16x1xf32>
    %cst_273 = arith.constant 3.200000e+01 : f32
    %391 = vector.broadcast %cst_273 : f32 to vector<16x1xf32>
    %392 = arith.divf %390, %391 : vector<16x1xf32>
    %393 = vector.broadcast %392 : vector<16x1xf32> to vector<16x32xf32>
    %394 = arith.subf %384, %393 : vector<16x32xf32>
    %395 = arith.mulf %394, %394 : vector<16x32xf32>
    %cst_274 = arith.constant dense<0.000000e+00> : vector<16xf32>
    %396 = vector.multi_reduction <add>, %395, %cst_274 [1] : vector<16x32xf32> to vector<16xf32>
    %397 = vector.shape_cast %396 : vector<16xf32> to vector<16x1xf32>
    %cst_275 = arith.constant 3.200000e+01 : f32
    %398 = vector.broadcast %cst_275 : f32 to vector<16x1xf32>
    %399 = arith.divf %397, %398 : vector<16x1xf32>
    %400 = vector.broadcast %392 : vector<16x1xf32> to vector<16x32xf32>
    %401 = arith.subf %384, %400 : vector<16x32xf32>
    %cst_276 = arith.constant 9.99999996E-13 : f32
    %402 = vector.broadcast %cst_276 : f32 to vector<16x1xf32>
    %403 = arith.addf %399, %402 : vector<16x1xf32>
    %404 = math.rsqrt %403 : vector<16x1xf32>
    %405 = vector.broadcast %404 : vector<16x1xf32> to vector<16x32xf32>
    %406 = arith.mulf %401, %405 : vector<16x32xf32>
    %407 = vector.broadcast %386 : vector<1x32xf32> to vector<16x32xf32>
    %408 = arith.mulf %407, %406 : vector<16x32xf32>
    %409 = vector.broadcast %388 : vector<1x32xf32> to vector<16x32xf32>
    %410 = arith.addf %408, %409 : vector<16x32xf32>
    %c1_277 = arith.constant 1 : index
    %c0_278 = arith.constant 0 : index
    %c0_279 = arith.constant 0 : index
    %411 = vector.load %arg5[%c1_277, %c0_278, %c0_279] : memref<2x32x128xf32, #tpu.memory_space<vmem>>, vector<1x32x128xf32>
    %412 = vector.shape_cast %411 : vector<1x32x128xf32> to vector<32x128xf32>
    %cst_280 = arith.constant dense<0.000000e+00> : vector<16x128xf32>
    %413 = tpu.matmul %410, %412, %cst_280 {dimension_numbers = #tpu.dot_dimension_numbers<[1], [0], [0], [1], [0, 0, 1, 1], [], []>} : vector<16x32xf32>, vector<32x128xf32>, vector<16x128xf32> -> vector<16x128xf32>
    %c1_281 = arith.constant 1 : index
    %c0_282 = arith.constant 0 : index
    %c0_283 = arith.constant 0 : index
    %414 = vector.load %arg6[%c1_281, %c0_282, %c0_283] : memref<2x1x128xf32, #tpu.memory_space<vmem>>, vector<1x1x128xf32>
    %415 = vector.shape_cast %414 : vector<1x1x128xf32> to vector<1x128xf32>
    %416 = vector.broadcast %415 : vector<1x128xf32> to vector<16x128xf32>
    %417 = arith.addf %413, %416 : vector<16x128xf32>
    %cst_284 = arith.constant 5.000000e-01 : f32
    %418 = vector.broadcast %cst_284 : f32 to vector<16x128xf32>
    %419 = arith.mulf %417, %418 : vector<16x128xf32>
    %cst_285 = arith.constant 1.41421354 : f32
    %420 = vector.broadcast %cst_285 : f32 to vector<16x128xf32>
    %421 = arith.divf %417, %420 : vector<16x128xf32>
    %cst_286 = arith.constant 0.000000e+00 : f32
    %422 = vector.broadcast %cst_286 : f32 to vector<16x128xf32>
    %423 = arith.cmpf oge, %421, %422 : vector<16x128xf32>
    %cst_287 = arith.constant 1.000000e+00 : f32
    %cst_288 = arith.constant -1.000000e+00 : f32
    %424 = vector.broadcast %cst_287 : f32 to vector<16x128xf32>
    %425 = vector.broadcast %cst_288 : f32 to vector<16x128xf32>
    %426 = arith.select %423, %424, %425 : vector<16x128xi1>, vector<16x128xf32>
    %427 = math.absf %421 : vector<16x128xf32>
    %cst_289 = arith.constant 0.327591091 : f32
    %428 = vector.broadcast %cst_289 : f32 to vector<16x128xf32>
    %429 = arith.mulf %428, %427 : vector<16x128xf32>
    %cst_290 = arith.constant 1.000000e+00 : f32
    %430 = vector.broadcast %cst_290 : f32 to vector<16x128xf32>
    %431 = arith.addf %430, %429 : vector<16x128xf32>
    %cst_291 = arith.constant 1.000000e+00 : f32
    %432 = vector.broadcast %cst_291 : f32 to vector<16x128xf32>
    %433 = arith.divf %432, %431 : vector<16x128xf32>
    %cst_292 = arith.constant 1.06140542 : f32
    %434 = vector.broadcast %cst_292 : f32 to vector<16x128xf32>
    %435 = arith.mulf %434, %433 : vector<16x128xf32>
    %cst_293 = arith.constant -1.45315206 : f32
    %436 = vector.broadcast %cst_293 : f32 to vector<16x128xf32>
    %437 = arith.addf %435, %436 : vector<16x128xf32>
    %438 = arith.mulf %437, %433 : vector<16x128xf32>
    %cst_294 = arith.constant 1.42141378 : f32
    %439 = vector.broadcast %cst_294 : f32 to vector<16x128xf32>
    %440 = arith.addf %438, %439 : vector<16x128xf32>
    %441 = arith.mulf %440, %433 : vector<16x128xf32>
    %cst_295 = arith.constant -0.284496725 : f32
    %442 = vector.broadcast %cst_295 : f32 to vector<16x128xf32>
    %443 = arith.addf %441, %442 : vector<16x128xf32>
    %444 = arith.mulf %443, %433 : vector<16x128xf32>
    %cst_296 = arith.constant 0.254829586 : f32
    %445 = vector.broadcast %cst_296 : f32 to vector<16x128xf32>
    %446 = arith.addf %444, %445 : vector<16x128xf32>
    %447 = arith.mulf %446, %433 : vector<16x128xf32>
    %cst_297 = arith.constant 0.000000e+00 : f32
    %448 = vector.broadcast %cst_297 : f32 to vector<16x128xf32>
    %449 = arith.subf %448, %427 : vector<16x128xf32>
    %450 = arith.mulf %449, %427 : vector<16x128xf32>
    %451 = math.exp %450 : vector<16x128xf32>
    %452 = arith.mulf %447, %451 : vector<16x128xf32>
    %cst_298 = arith.constant 1.000000e+00 : f32
    %453 = vector.broadcast %cst_298 : f32 to vector<16x128xf32>
    %454 = arith.subf %453, %452 : vector<16x128xf32>
    %455 = arith.mulf %426, %454 : vector<16x128xf32>
    %cst_299 = arith.constant 1.000000e+00 : f32
    %456 = vector.broadcast %cst_299 : f32 to vector<16x128xf32>
    %457 = arith.addf %456, %455 : vector<16x128xf32>
    %458 = arith.mulf %419, %457 : vector<16x128xf32>
    %c1_300 = arith.constant 1 : index
    %c0_301 = arith.constant 0 : index
    %c0_302 = arith.constant 0 : index
    %459 = vector.load %arg7[%c1_300, %c0_301, %c0_302] : memref<2x128x32xf32, #tpu.memory_space<vmem>>, vector<1x128x32xf32>
    %460 = vector.shape_cast %459 : vector<1x128x32xf32> to vector<128x32xf32>
    %cst_303 = arith.constant dense<0.000000e+00> : vector<16x32xf32>
    %461 = tpu.matmul %458, %460, %cst_303 {dimension_numbers = #tpu.dot_dimension_numbers<[1], [0], [0], [1], [0, 0, 1, 1], [], []>} : vector<16x128xf32>, vector<128x32xf32>, vector<16x32xf32> -> vector<16x32xf32>
    %c1_304 = arith.constant 1 : index
    %c3_305 = arith.constant 3 : index
    %c0_306 = arith.constant 0 : index
    %c0_307 = arith.constant 0 : index
    %462 = vector.load %arg8[%c1_304, %c3_305, %c0_306, %c0_307] : memref<2x6x1x32xf32, #tpu.memory_space<vmem>>, vector<1x1x1x32xf32>
    %463 = vector.shape_cast %462 : vector<1x1x1x32xf32> to vector<1x32xf32>
    %464 = vector.broadcast %463 : vector<1x32xf32> to vector<16x32xf32>
    %465 = arith.addf %461, %464 : vector<16x32xf32>
    %466 = arith.addf %465, %410 : vector<16x32xf32>
    %c1_308 = arith.constant 1 : index
    %c4_309 = arith.constant 4 : index
    %c0_310 = arith.constant 0 : index
    %c0_311 = arith.constant 0 : index
    %467 = vector.load %arg8[%c1_308, %c4_309, %c0_310, %c0_311] : memref<2x6x1x32xf32, #tpu.memory_space<vmem>>, vector<1x1x1x32xf32>
    %468 = vector.shape_cast %467 : vector<1x1x1x32xf32> to vector<1x32xf32>
    %c1_312 = arith.constant 1 : index
    %c5_313 = arith.constant 5 : index
    %c0_314 = arith.constant 0 : index
    %c0_315 = arith.constant 0 : index
    %469 = vector.load %arg8[%c1_312, %c5_313, %c0_314, %c0_315] : memref<2x6x1x32xf32, #tpu.memory_space<vmem>>, vector<1x1x1x32xf32>
    %470 = vector.shape_cast %469 : vector<1x1x1x32xf32> to vector<1x32xf32>
    %cst_316 = arith.constant dense<0.000000e+00> : vector<16xf32>
    %471 = vector.multi_reduction <add>, %466, %cst_316 [1] : vector<16x32xf32> to vector<16xf32>
    %472 = vector.shape_cast %471 : vector<16xf32> to vector<16x1xf32>
    %cst_317 = arith.constant 3.200000e+01 : f32
    %473 = vector.broadcast %cst_317 : f32 to vector<16x1xf32>
    %474 = arith.divf %472, %473 : vector<16x1xf32>
    %475 = vector.broadcast %474 : vector<16x1xf32> to vector<16x32xf32>
    %476 = arith.subf %466, %475 : vector<16x32xf32>
    %477 = arith.mulf %476, %476 : vector<16x32xf32>
    %cst_318 = arith.constant dense<0.000000e+00> : vector<16xf32>
    %478 = vector.multi_reduction <add>, %477, %cst_318 [1] : vector<16x32xf32> to vector<16xf32>
    %479 = vector.shape_cast %478 : vector<16xf32> to vector<16x1xf32>
    %cst_319 = arith.constant 3.200000e+01 : f32
    %480 = vector.broadcast %cst_319 : f32 to vector<16x1xf32>
    %481 = arith.divf %479, %480 : vector<16x1xf32>
    %482 = vector.broadcast %474 : vector<16x1xf32> to vector<16x32xf32>
    %483 = arith.subf %466, %482 : vector<16x32xf32>
    %cst_320 = arith.constant 9.99999996E-13 : f32
    %484 = vector.broadcast %cst_320 : f32 to vector<16x1xf32>
    %485 = arith.addf %481, %484 : vector<16x1xf32>
    %486 = math.rsqrt %485 : vector<16x1xf32>
    %487 = vector.broadcast %486 : vector<16x1xf32> to vector<16x32xf32>
    %488 = arith.mulf %483, %487 : vector<16x32xf32>
    %489 = vector.broadcast %468 : vector<1x32xf32> to vector<16x32xf32>
    %490 = arith.mulf %489, %488 : vector<16x32xf32>
    %491 = vector.broadcast %470 : vector<1x32xf32> to vector<16x32xf32>
    %492 = arith.addf %490, %491 : vector<16x32xf32>
    %c0_321 = arith.constant 0 : index
    %c0_322 = arith.constant 0 : index
    %493 = vector.load %arg9[%c0_321, %c0_322] : memref<16x32xf32, #tpu.memory_space<vmem>>, vector<16x32xf32>
    tpu.vector_store %arg9[%c0_321, %c0_322], %492 {strides = array<i32>} : memref<16x32xf32, #tpu.memory_space<vmem>>, vector<16x32xf32>,
    return
  }
}

</mosaic_0001>

<bundles_post_ra>
// kernel: tpu_custom_call.1
= control target key start
LH: loop header
LB: loop body
LE: loop exit
PB: predicated region body
PF: predicated region fallthrough
CT: control target
= control target key end

     0   :  { %vm46_vm0 = vcmask 261120   ;;  %s5458_s0 = inlined_call_operand.vmem [shape: f32[16,32], index: 0, kind: input, shape index: {}]   ;;  %s5459_s1 = inlined_call_operand.vmem [shape: f32[2,8,8], index: 1, kind: input, shape index: {}]   ;;  %s5460_s2 = inlined_call_operand.vmem [shape: f32[2,6,32,16], index: 2, kind: input, shape index: {}]   ;;  %s5461_s3 = inlined_call_operand.vmem [shape: f32[2,6,1,16], index: 3, kind: input, shape index: {}]   ;;  %s5462_s4 = inlined_call_operand.vmem [shape: f32[2,2,16,32], index: 4, kind: input, shape index: {}]   ;;  %s5463_s5 = inlined_call_operand.vmem [shape: f32[2,32,128], index: 5, kind: input, shape index: {}]   ;;  %s5464_s6 = inlined_call_operand.vmem [shape: f32[2,1,128], index: 6, kind: input, shape index: {}]   ;;  %s5465_s7 = inlined_call_operand.vmem [shape: f32[2,128,32], index: 7, kind: input, shape index: {}]   ;;  %s5466_s8 = inlined_call_operand.vmem [shape: f32[2,6,1,32], index: 8, kind: input, shape index: {}]   ;;  %s5467_s9 = inlined_call_operand.hbm [shape: f32[16,32], index: 9, kind: output, shape index: {}]  }
   0x1   :  { %v35_v0 = vld [vmem:[%s5460_s2] sm:$0xff]  ;;  %v36_v1 = vld [vmem:[%s5460_s2 + $0x8] sm:$0xff]  ;;  %v37_v2 = vld [vmem:[%s5460_s2 + $0x10] sm:$0xff] }
   0x2   :  { %v4438_v3 = vpack.c.bf16 %v36_v1, %v35_v0  ;;  %v38_v4 = vld [vmem:[%s5460_s2 + $0x18] sm:$0xff]  ;;  %v4805_v5 = vld [vmem:[%s5458_s0] sm:$0xff]  ;;  %v3726_v8 = vld [vmem:[%s5460_s2 + $0x28] sm:$0xff] }
   0x3   :  { %v4442_v6 = vpack.c.bf16 %v38_v4, %v37_v2  ;;  %4086 = vmatprep.mubr.msk.f32.mxu0 %vm46_vm0, %v4805_v5  ;;  %v3725_v7 = vld [vmem:[%s5460_s2 + $0x20] sm:$0xff]  ;;  %4119 = vmatprep.mubr.msk.f32.mxu1 %vm46_vm0, %v4805_v5 }
   0x4   :  { %4439 = vmatprep.subr.bf16.mxu0 %v4438_v3  ;;  %v4446_v9 = vpack.c.bf16 %v3726_v8, %v3725_v7 }
   0x5   :  { %4441 = vmatpush3.bf16.msra.mxu0 %v4438_v3 }
   0x6   :  { %4443 = vmatprep.subr.bf16.mxu0 %v4442_v6 }
   0x7   :  { %14 = vsyncpa [#allocation3], 0  ;;  %v3727_v10 = vld [vmem:[%s5460_s2 + $0x30] sm:$0xff]  ;;  %v3728_v11 = vld [vmem:[%s5460_s2 + $0x38] sm:$0xff]  ;;  %v4733_v26 = vmov 0.0   ;;  %vm4734_vm1 = vmmov 0  }
   0x8   :  { %v4826_v12 = vld [vmem:[%s5458_s0 + $0x8] sm:$0xff]  ;;  %v4450_v13 = vpack.c.bf16 %v3728_v11, %v3727_v10  ;;  %v3733_v14 = vld [vmem:[%s5460_s2 + $0x40] sm:$0xff]  ;;  %v3735_v17 = vld [vmem:[%s5460_s2 + $0x50] sm:$0xff]  ;;  %vm569_vm2 = vcmask 130048   ;;  %vm648_vm3 = vcmask 64512   ;;  %s4737_s21 = smov [#allocation2]  }
   0x9   :  { %4445 = vmatpush3.bf16.msra.mxu0 %v4442_v6  ;;  %v3734_v15 = vld [vmem:[%s5460_s2 + $0x48] sm:$0xff]  ;;  %v3736_v18 = vld [vmem:[%s5460_s2 + $0x58] sm:$0xff]  ;;  %v3749_v20 = vld [vmem:[%s5460_s2 + $0x80] sm:$0xff]  ;;  %s3711_s22 = sshll.u32 %s4737_s21, 4  ;;  %s3712_s22 = int_to_ptr.vmem [resolvable:$true] %s3711_s22 }
   0xa   :  { %4447 = vmatprep.subr.bf16.mxu0 %v4446_v9  ;;  %v4454_v16 = vpack.c.bf16 %v3734_v15, %v3733_v14  ;;  %v4458_v19 = vpack.c.bf16 %v3736_v18, %v3735_v17  ;;  %v3750_v21 = vld [vmem:[%s5460_s2 + $0x88] sm:$0xff]  ;;  %v3751_v23 = vld [vmem:[%s5460_s2 + $0x90] sm:$0xff]  ;;  %v3752_v24 = vld [vmem:[%s5460_s2 + $0x98] sm:$0xff]  ;;  %p4714_p1 = scmp.lt.s32.totalorder %s3712_s22, %s3712_s22 }
   0xb   :  { %v4470_v22 = vpack.c.bf16 %v3750_v21, %v3749_v20  ;;  %v4474_v25 = vpack.c.bf16 %v3752_v24, %v3751_v23  ;;  %v3722_v27 = vld [vmem:[%s5461_s3] ss:$0 sm:$0xff]  ;;  %v3730_v31 = vld [vmem:[%s5461_s3 + $0x1] ss:$0 sm:$0xff]  ;;  %v3738_v37 = vld [vmem:[%s5461_s3 + $0x2] ss:$0 sm:$0xff] }
   0xc   :  { %4087 = vmatmul.mubr.msk.f32.vlgmr.msra.gmra.mrb[0].mxu0 %vm46_vm0, %v4826_v12  ;;  %v3754_v42 = vld [vmem:[%s5461_s3 + $0x4] ss:$0 sm:$0xff]  ;;  %v3742_v47 = vld [vmem:[%s5460_s2 + $0x68] sm:$0xff]  ;;  %v3743_v48 = vld [vmem:[%s5460_s2 + $0x70] sm:$0xff] }
   0xd   :  { %4449 = vmatpush3.bf16.msra.mxu0 %v4446_v9  ;;  %4097 = vmatprep.mubr.msk.f32.mxu0 %vm46_vm0, %v4805_v5  ;;  %v3741_v46 = vld [vmem:[%s5460_s2 + $0x60] sm:$0xff]  ;;  %v3744_v50 = vld [vmem:[%s5460_s2 + $0x78] sm:$0xff]  ;;  %v3758_v10 = vld [vmem:[%s5460_s2 + $0xa8] sm:$0xff] }
   0xe   :  { %4451 = vmatprep.subr.bf16.mxu0 %v4450_v13  ;;  %v4462_v49 = vpack.c.bf16 %v3742_v47, %v3741_v46  ;;  %v4466_v51 = vpack.c.bf16 %v3744_v50, %v3743_v48  ;;  %v4914_v53 = vld [vmem:[%s5459_s1] sm:$0xff]  ;;  %v3759_v11 = vld [vmem:[%s5460_s2 + $0xb0] sm:$0xff]  ;;  %v3760_v14 = vld [vmem:[%s5460_s2 + $0xb8] sm:$0xff] }
   0xf   :  { %v3746_v0 = vld [vmem:[%s5461_s3 + $0x3] ss:$0 sm:$0xff]  ;;  %v4482_v15 = vpack.c.bf16 %v3760_v14, %v3759_v11 }
  0x10   :  { %4463 = vmatprep.subr.bf16.mxu1 %v4462_v49  ;;  %v3757_v9 = vld [vmem:[%s5460_s2 + $0xa0] sm:$0xff] }
  0x11   :  { %4453 = vmatpush3.bf16.msra.mxu0 %v4450_v13  ;;  %4465 = vmatpush3.bf16.msra.mxu1 %v4462_v49  ;;  %v4478_v13 = vpack.c.bf16 %v3758_v10, %v3757_v9 }
  0x12   :  { %4455 = vmatprep.subr.bf16.mxu0 %v4454_v16  ;;  %4467 = vmatprep.subr.bf16.mxu1 %v4466_v51 }
  0x14   :  { %4098 = vmatmul.mubr.msk.f32.vlgmr.msra.gmra.mrb[2].mxu0 %vm46_vm0, %v4826_v12 }
  0x15   :  { %4457 = vmatpush3.bf16.msra.mxu0 %v4454_v16  ;;  %4108 = vmatprep.mubr.msk.f32.mxu0 %vm46_vm0, %v4805_v5 }
  0x16   :  { %4459 = vmatprep.subr.bf16.mxu0 %v4458_v19  ;;  %4469 = vmatpush3.bf16.msra.mxu1 %v4466_v51 }
  0x17   :  { %4479 = vmatprep.subr.bf16.mxu1 %v4478_v13 }
  0x19   :  { %4461 = vmatpush3.bf16.msra.mxu0 %v4458_v19  ;;  %4120 = vmatmul.mubr.msk.f32.vlgmr.msra.gmra.mrb[0].mxu1 %vm46_vm0, %v4826_v12 }
  0x1a   :  { %4471 = vmatprep.subr.bf16.mxu0 %v4470_v22  ;;  %4141 = vmatprep.mubr.msk.f32.mxu1 %vm46_vm0, %v4805_v5 }
  0x1b   :  { %4481 = vmatpush3.bf16.msra.mxu1 %v4478_v13 }
  0x1c   :  { %4109 = vmatmul.mubr.msk.f32.vlgmr.msra.gmra.mrb[4].mxu0 %vm46_vm0, %v4826_v12  ;;  %4483 = vmatprep.subr.bf16.mxu1 %v4482_v15 }
  0x1d   :  { %4473 = vmatpush3.bf16.msra.mxu0 %v4470_v22  ;;  %4130 = vmatprep.mubr.msk.f32.mxu0 %vm46_vm0, %v4805_v5 }
  0x1e   :  { %4475 = vmatprep.subr.bf16.mxu0 %v4474_v25 }
  0x1f   :  { %4485 = vmatpush3.bf16.msra.mxu1 %v4482_v15 }
  0x20   :  { %4159 = vmatprep.subr.mxu1 %v4733_v26 }
  0x21   :  { %4477 = vmatpush3.bf16.msra.mxu0 %v4474_v25 }
  0x22   :  { %4144 = vmatprep.subr.mxu0 %v4733_v26  ;;  %4142 = vmatmul.mubr.msk.f32.vlgmr.msra.gmra.mrb[2].mxu1 %vm46_vm0, %v4826_v12 }
  0x23   :  { %4161 = vmatprep.mubr.msk.f32.mxu1 %vm4734_vm1, %v4733_v26 }
  0x24   :  { %4131 = vmatmul.mubr.msk.f32.vlgmr.msra.gmra.mrb[6].mxu0 %vm46_vm0, %v4826_v12 }
  0x25   :  { %4146 = vmatprep.mubr.msk.f32.mxu0 %vm4734_vm1, %v4733_v26 }
  0xdf   :  { %v4088_v28 = vpop.f32.mrb[0].mxu0 }
  0xe0   :  { %v4872_v29 = vadd.f32 %v4088_v28, %v3722_v27  ;;  %v119_v30 = vpop.f32.mrb[1].mxu0 }
  0xe1   :  { %v120_v36 = vadd.f32 %v3722_v27, %v119_v30 }
  0xe7   :  { %v4099_v32 = vpop.f32.mrb[2].mxu0 }
  0xe8   :  { %v4877_v33 = vadd.f32 %v4099_v32, %v3730_v31  ;;  %v207_v34 = vpop.f32.mrb[3].mxu0 }
  0xe9   :  { %v208_v35 = vadd.f32 %v3730_v31, %v207_v34  ;;  %v3762_v31 = vld [vmem:[%s5461_s3 + $0x5] ss:$0 sm:$0xff] }
  0xeb   :  { %4145 = vmatpush3.xpose.msk.msra.mxu0 %vm569_vm2, %v208_v35 }
  0xec   :  { %4149 = vmatprep.subr.mxu0 %v4733_v26  ;;  %v4121_v63 = vpop.f32.mrb[0].mxu1 }
  0xed   :  { %v4922_v1 = vadd.f32 %v4121_v63, %v3746_v0  ;;  %v383_v2 = vpop.f32.mrb[1].mxu1 }
  0xee   :  { %4147 = vmatmul.mubr.msk.f32.vlgmr.msra.gmra.mrb[8].mxu0 %vm569_vm2, %v120_v36  ;;  %v384_v8 = vadd.f32 %v3746_v0, %v383_v2  ;;  %v4735_v36 = vmov 0.0|0.0  }
  0xef   :  { %v4110_v38 = vpop.f32.mrb[4].mxu0  ;;  %4151 = vmatprep.mubr.msk.f32.mxu0 %vm4734_vm1, %v4733_v26 }
  0xf0   :  { %v4887_v39 = vadd.f32 %v4110_v38, %v3738_v37  ;;  %v295_v40 = vpop.f32.mrb[5].mxu0  ;;  %v3772_v38 = vld [vmem:[%s5462_s4 + $0x18] sm:$0xff] }
  0xf1   :  { %v296_v41 = vadd.f32 %v3738_v37, %v295_v40  ;;  %v3771_v37 = vld [vmem:[%s5462_s4 + $0x10] sm:$0xff] }
  0xf2   :  { %v4487_v40 = vpack.c.bf16 %v3772_v38, %v3771_v37  ;;  %v3788_v38 = vld [vmem:[%s5466_s8 + $0x2] ss:$0 sm:$0xff] }
  0xf3   :  { %4150 = vmatpush3.msra.mxu0 %v296_v41 }
  0xf4   :  { %4154 = vmatprep.subr.mxu0 %v4733_v26 }
  0xf5   :  { %v4143_v30 = vpop.f32.mrb[2].mxu1 }
  0xf6   :  { %v559_v32 = vpop.f32.mrb[3].mxu1  ;;  %v4954_v34 = vadd.f32 %v4143_v30, %v3762_v31 }
  0xf7   :  { %v4132_v43 = vpop.f32.mrb[6].mxu0  ;;  %v560_v35 = vadd.f32 %v3762_v31, %v559_v32  ;;  %v3787_v32 = vld [vmem:[%s5466_s8 + $0x1] ss:$0 sm:$0xff] }
  0xf8   :  { %v4893_v44 = vadd.f32 %v4132_v43, %v3754_v42  ;;  %v471_v45 = vpop.f32.mrb[7].mxu0  ;;  %v734_v43 = vld [vmem:[%s5462_s4 + $0x8] sm:$0xff] }
  0xf9   :  { %v472_v7 = vadd.f32 %v3754_v42, %v471_v45  ;;  %4160 = vmatpush3.msra.mxu1 %v560_v35  ;;  %v733_v42 = vld [vmem:[%s5462_s4] sm:$0xff] }
  0xfa   :  { %4489 = vmatprep.subr.bf16.mxu1 %v4735_v36  ;;  %v4971_v46 = vpack.c.bf16 %v734_v43, %v733_v42 }
 0x1c1   :  { %v642_v52 = vpop.f32.mrb[8].mxu0 }
 0x1c2   :  { %v646_v54 = vmul.f32 0.25, %v642_v52  ;;  %v4148_v55 = vpop.f32.mrb[9].mxu0 }
 0x1c4   :  { %v647_v56 = vadd.f32 %v646_v54, %v4914_v53 }
 0x1c6   :  { %v649_v57 = vsel %vm648_vm3, %v647_v56, -inf }
 0x1c7   :  { %650 = vmax.xlane.f32.xlu0 %v649_v57 }
 0x254   :  { %v651_v58 = vpop.xlane.xlu0 %650 }
 0x255   :  { %v652_v59 = vsub.f32 %v647_v56, %v651_v58 }
 0x257   :  { %v653_v60 = vmul.f32 1.442695, %v652_v59 }
 0x259   :  { %4645 = vpow2.f32 %v653_v60 }
 0x263   :  { %v4646_v61 = vpop.eup %4645 }
 0x264   :  { %v655_v62 = vsel %vm648_vm3, %v4646_v61, 0.0 }
 0x265   :  { %656 = vadd.xlane.f32.xlu0 %v655_v62 }
 0x2f2   :  { %v657_v3 = vpop.xlane.xlu0 %656 }
 0x2f3   :  { %4647 = vrcp.f32 %v657_v3 }
 0x2fd   :  { %v4648_v4 = vpop.eup %4647 }
 0x2fe   :  { %v659_v6 = vmul.f32 %v4648_v4, %v4646_v61 }
 0x300   :  { %4152 = vmatmul.mubr.msk.f32.vlgmr.msra.gmra.mrb[10].mxu0 %vm648_vm3, %v659_v6  ;;  %v3784_v6 = vld [vmem:[%s5466_s8] ss:$0 sm:$0xff] }
 0x301   :  { %4155 = vmatpush3.xpose.msk.msra.mxu0 %vm569_vm2, %v472_v7  ;;  %4156 = vmatprep.mubr.msk.f32.mxu0 %vm4734_vm1, %v4733_v26 }
 0x302   :  { %4486 = vmatprep.subr.bf16.mxu0 %v4735_v36 }
 0x304   :  { %4157 = vmatmul.mubr.msk.f32.vlgmr.msra.gmra.mrb[12].mxu0 %vm569_vm2, %v384_v8 }
 0x305   :  { %4168 = vmatprep.mubr.msk.f32.mxu0 %vm4734_vm1, %v4733_v26  ;;  %4488 = vmatpush3.bf16.msra.mxu0 %v4487_v40 }
 0x306   :  { %4178 = vmatprep.subr.mxu0 %v4733_v26 }
 0x3d3   :  { %v729_v16 = vpop.f32.mrb[10].mxu0 }
 0x3d4   :  { %v4153_v17 = vpop.f32.mrb[11].mxu0 }
 0x3d7   :  { %v807_v18 = vpop.f32.mrb[12].mxu0 }
 0x3d8   :  { %v811_v19 = vmul.f32 0.25, %v807_v18  ;;  %v4158_v20 = vpop.f32.mrb[13].mxu0 }
 0x3da   :  { %v812_v21 = vadd.f32 %v811_v19, %v4914_v53 }
 0x3dc   :  { %v813_v22 = vsel %vm648_vm3, %v812_v21, -inf }
 0x3dd   :  { %814 = vmax.xlane.f32.xlu1 %v813_v22 }
 0x46a   :  { %v815_v23 = vpop.xlane.xlu1 %814 }
 0x46b   :  { %v816_v24 = vsub.f32 %v812_v21, %v815_v23 }
 0x46d   :  { %v817_v25 = vmul.f32 1.442695, %v816_v24 }
 0x46f   :  { %4649 = vpow2.f32 %v817_v25 }
 0x479   :  { %v4650_v27 = vpop.eup %4649 }
 0x47a   :  { %v819_v28 = vsel %vm648_vm3, %v4650_v27, 0.0 }
 0x47b   :  { %820 = vadd.xlane.f32.xlu1 %v819_v28 }
 0x508   :  { %v821_v41 = vpop.xlane.xlu1 %820 }
 0x509   :  { %4651 = vrcp.f32 %v821_v41 }
 0x513   :  { %v4652_v45 = vpop.eup %4651 }
 0x514   :  { %v823_v47 = vmul.f32 %v4652_v45, %v4650_v27 }
 0x516   :  { %4162 = vmatmul.mubr.msk.f32.vlgmr.msra.gmra.mrb[4].mxu1 %vm648_vm3, %v823_v47 }
 0x517   :  { %4491 = vmatpush3.bf16.msra.mxu1 %v4971_v46  ;;  %4175 = vmatprep.mubr.msk.f32.mxu1 %vm4734_vm1, %v4733_v26 }
 0x518   :  { %4183 = vmatprep.subr.mxu1 %v4733_v26 }
 0x51a   :  { %4176 = vmatmul.mubr.msk.f32.vlgmr.msra.gmra.mrb[6].mxu1 %vm569_vm2, %v729_v16 }
 0x51b   :  { %4184 = vmatpush3.msra.mxu1 %v4887_v39  ;;  %4185 = vmatprep.mubr.msk.f32.mxu1 %vm4734_vm1, %v4733_v26 }
 0x51c   :  { %4193 = vmatprep.subr.mxu1 %v4733_v26 }
 0x5e9   :  { %v893_v48 = vpop.f32.mrb[4].mxu1 }
 0x5ea   :  { %v4163_v49 = vpop.f32.mrb[5].mxu1  ;;  %4169 = vmatmul.mubr.msk.f32.vlgmr.msra.gmra.mrb[14].mxu0 %vm569_vm2, %v893_v48 }
 0x5eb   :  { %4179 = vmatpush3.xpose.msk.msra.mxu0 %vm569_vm2, %v4877_v33  ;;  %4180 = vmatprep.mubr.msk.f32.mxu0 %vm4734_vm1, %v4733_v26 }
 0x5ec   :  { %4188 = vmatprep.subr.mxu0 %v4733_v26 }
 0x5ed   :  { %v1042_v50 = vpop.f32.mrb[6].mxu1 }
 0x5ee   :  { %v4177_v51 = vpop.f32.mrb[7].mxu1  ;;  %4181 = vmatmul.mubr.msk.f32.vlgmr.msra.gmra.mrb[16].mxu0 %vm569_vm2, %v4872_v29  ;;  %v5003_v29 = vld [vmem:[%s5459_s1 + $0x8] sm:$0xff] }
 0x5ef   :  { %4189 = vmatpush3.xpose.msk.msra.mxu0 %vm569_vm2, %v4893_v44  ;;  %4190 = vmatprep.mubr.msk.f32.mxu0 %vm4734_vm1, %v4733_v26 }
 0x5f0   :  { %4492 = vmatprep.subr.bf16.mxu0 %v4735_v36 }
 0x5f2   :  { %4191 = vmatmul.mubr.msk.f32.vlgmr.msra.gmra.mrb[18].mxu0 %vm569_vm2, %v4922_v1 }
 0x5f3   :  { %4494 = vmatpush3.bf16.msra.mxu0 %v4487_v40  ;;  %4202 = vmatprep.mubr.msk.f32.mxu0 %vm4734_vm1, %v4733_v26 }
 0x6bd   :  { %v969_v33 = vpop.f32.mrb[14].mxu0 }
 0x6be   :  { %v1043_v39 = vadd.f32 %v1042_v50, %v969_v33  ;;  %v4170_v52 = vpop.f32.mrb[15].mxu0 }
 0x6c0   :  { %v1525_v7 = vadd.f32 %v3784_v6, %v1043_v39 }
 0x6c1   :  { %v1120_v54 = vpop.f32.mrb[16].mxu0 }
 0x6c2   :  { %v1124_v44 = vmul.f32 0.25, %v1120_v54  ;;  %v4182_v55 = vpop.f32.mrb[17].mxu0  ;;  %v1527_v10 = vadd.f32 %v1525_v7, %v4805_v5  ;;  %v1725_v7 = vld [vmem:[%s5465_s7 + $0x10] sm:$0xff] }
 0x6c3   :  { %v1576_v55 = vld [vmem:[%s5463_s5] sm:$0xff] }
 0x6c4   :  { %v1125_v56 = vadd.f32 %v5003_v29, %v1124_v44  ;;  %v1533_v13 = vsel %vm46_vm0, %v1527_v10, 0.0 }
 0x6c5   :  { %v1282_v57 = vpop.f32.mrb[18].mxu0 }
 0x6c6   :  { %v1286_v58 = vmul.f32 0.25, %v1282_v57  ;;  %v4192_v59 = vpop.f32.mrb[19].mxu0  ;;  %v1126_v60 = vsel %vm648_vm3, %v1125_v56, -inf }
 0x6c7   :  { %1127 = vmax.xlane.f32.xlu0 %v1126_v60 }
 0x6c8   :  { %v1287_v61 = vadd.f32 %v5003_v29, %v1286_v58  ;;  %v1579_v58 = vld [vmem:[%s5463_s5 + $0x18] sm:$0xff] }
 0x6ca   :  { %v1288_v62 = vsel %vm648_vm3, %v1287_v61, -inf }
 0x6cb   :  { %1289 = vmax.xlane.f32.xlu1 %v1288_v62 }
 0x754   :  { %v1128_v63 = vpop.xlane.xlu0 %1127 }
 0x755   :  { %v1129_v0 = vsub.f32 %v1125_v56, %v1128_v63  ;;  %v1577_v56 = vld [vmem:[%s5463_s5 + $0x8] sm:$0xff] }
 0x756   :  { %v4498_v57 = vpack.c.bf16 %v1577_v56, %v1576_v55 }
 0x757   :  { %v1130_v1 = vmul.f32 1.442695, %v1129_v0 }
 0x758   :  { %v1290_v2 = vpop.xlane.xlu1 %1289  ;;  %4499 = vmatprep.subr.bf16.mxu0 %v4498_v57 }
 0x759   :  { %4653 = vpow2.f32 %v1130_v1  ;;  %v1291_v3 = vsub.f32 %v1287_v61, %v1290_v2 }
 0x75b   :  { %v1292_v4 = vmul.f32 1.442695, %v1291_v3  ;;  %v1723_v3 = vld [vmem:[%s5465_s7] sm:$0xff] }
 0x75d   :  { %4655 = vpow2.f32 %v1292_v4  ;;  %v1724_v4 = vld [vmem:[%s5465_s7 + $0x8] sm:$0xff] }
 0x763   :  { %v4654_v8 = vpop.eup %4653 }
 0x764   :  { %v1132_v9 = vsel %vm648_vm3, %v4654_v8, 0.0 }
 0x765   :  { %1133 = vadd.xlane.f32.xlu0 %v1132_v9 }
 0x767   :  { %v4656_v11 = vpop.eup %4655 }
 0x768   :  { %v1294_v14 = vsel %vm648_vm3, %v4656_v11, 0.0 }
 0x769   :  { %1534 = vadd.xlane.f32.xlu0 %v1533_v13  ;;  %1295 = vadd.xlane.f32.xlu1 %v1294_v14  ;;  %v1729_v14 = vld [vmem:[%s5465_s7 + $0x30] sm:$0xff] }
 0x7f2   :  { %v1134_v15 = vpop.xlane.xlu0 %1133 }
 0x7f3   :  { %4657 = vrcp.f32 %v1134_v15  ;;  %v1730_v15 = vld [vmem:[%s5465_s7 + $0x38] sm:$0xff] }
 0x7f6   :  { %v1535_v16 = vpop.xlane.xlu0 %1534  ;;  %v1296_v17 = vpop.xlane.xlu1 %1295 }
 0x7f7   :  { %v1540_v18 = vmul.f32 0.03125, %v1535_v16  ;;  %4659 = vrcp.f32 %v1296_v17  ;;  %v4518_v16 = vpack.c.bf16 %v1730_v15, %v1729_v14  ;;  %v1731_v17 = vld [vmem:[%s5465_s7 + $0x40] sm:$0xff]  ;;  %v4736_v15 = vmov -1.0  }
 0x7f9   :  { %v1542_v19 = vsub.f32 %v1527_v10, %v1540_v18  ;;  %v1727_v10 = vld [vmem:[%s5465_s7 + $0x20] sm:$0xff]  ;;  %v1732_v18 = vld [vmem:[%s5465_s7 + $0x48] sm:$0xff] }
 0x7fb   :  { %v1544_v20 = vmul.f32 %v1542_v19, %v1542_v19 }
 0x7fd   :  { %v4658_v21 = vpop.eup %4657  ;;  %v1546_v22 = vsel %vm46_vm0, %v1544_v20, 0.0  ;;  %v1733_v20 = vld [vmem:[%s5465_s7 + $0x50] sm:$0xff] }
 0x7fe   :  { %v1136_v5 = vmul.f32 %v4658_v21, %v4654_v8  ;;  %1547 = vadd.xlane.f32.xlu0 %v1546_v22  ;;  %v1726_v8 = vld [vmem:[%s5465_s7 + $0x18] sm:$0xff] }
 0x7ff   :  { %v4510_v9 = vpack.c.bf16 %v1726_v8, %v1725_v7  ;;  %v1734_v21 = vld [vmem:[%s5465_s7 + $0x58] sm:$0xff] }
 0x800   :  { %4186 = vmatmul.mubr.msk.f32.vlgmr.msra.gmra.mrb[8].mxu1 %vm648_vm3, %v1136_v5  ;;  %v4526_v22 = vpack.c.bf16 %v1734_v21, %v1733_v20  ;;  %v1735_v5 = vld [vmem:[%s5465_s7 + $0x60] sm:$0xff] }
 0x801   :  { %v4660_v23 = vpop.eup %4659  ;;  %4194 = vmatpush3.msra.mxu1 %v4954_v34  ;;  %4195 = vmatprep.mubr.msk.f32.mxu1 %vm4734_vm1, %v4733_v26 }
 0x802   :  { %v1298_v24 = vmul.f32 %v4660_v23, %v4656_v11  ;;  %4495 = vmatprep.subr.bf16.mxu1 %v4735_v36  ;;  %v1728_v11 = vld [vmem:[%s5465_s7 + $0x28] sm:$0xff] }
 0x803   :  { %v4514_v13 = vpack.c.bf16 %v1728_v11, %v1727_v10  ;;  %v1736_v23 = vld [vmem:[%s5465_s7 + $0x68] sm:$0xff] }
 0x804   :  { %4196 = vmatmul.mubr.msk.f32.vlgmr.msra.gmra.mrb[10].mxu1 %vm648_vm3, %v1298_v24  ;;  %v4530_v24 = vpack.c.bf16 %v1736_v23, %v1735_v5 }
 0x805   :  { %4497 = vmatpush3.bf16.msra.mxu1 %v4971_v46  ;;  %4209 = vmatprep.mubr.msk.f32.mxu1 %vm4734_vm1, %v4733_v26 }
 0x88b   :  { %v1548_v25 = vpop.xlane.xlu0 %1547 }
 0x88c   :  { %v1552_v27 = vmul.f32 0.03125, %v1548_v25  ;;  %v1737_v25 = vld [vmem:[%s5465_s7 + $0x70] sm:$0xff] }
 0x88e   :  { %v1554_v28 = vadd.f32 1e-12, %v1552_v27  ;;  %v1738_v27 = vld [vmem:[%s5465_s7 + $0x78] sm:$0xff] }
 0x890   :  { %4661 = vrsqrt.f32 %v1554_v28  ;;  %v4534_v28 = vpack.c.bf16 %v1738_v27, %v1737_v25  ;;  %v3793_v27 = vld [vmem:[%s5466_s8 + $0x3] ss:$0 sm:$0xff] }
 0x89a   :  { %v4662_v30 = vpop.eup %4661 }
 0x89b   :  { %v1558_v31 = vmul.f32 %v4662_v30, %v1542_v19  ;;  %v4522_v19 = vpack.c.bf16 %v1732_v18, %v1731_v17  ;;  %v3789_v30 = vld [vmem:[%s5464_s6] ss:$0 sm:$0xff] }
 0x89d   :  { %v1566_v35 = vmul.f32 %v3787_v32, %v1558_v31 }
 0x89f   :  { %v5033_v41 = vadd.f32 %v3788_v38, %v1566_v35 }
 0x8d3   :  { %v1206_v34 = vpop.f32.mrb[8].mxu1 }
 0x8d4   :  { %v4187_v37 = vpop.f32.mrb[9].mxu1  ;;  %4210 = vmatmul.mubr.msk.f32.vlgmr.msra.gmra.mrb[12].mxu1 %vm569_vm2, %v1206_v34 }
 0x8d7   :  { %v1368_v40 = vpop.f32.mrb[10].mxu1 }
 0x8d8   :  { %v4197_v42 = vpop.f32.mrb[11].mxu1  ;;  %4203 = vmatmul.mubr.msk.f32.vlgmr.msra.gmra.mrb[20].mxu0 %vm569_vm2, %v1368_v40 }
 0x8d9   :  { %4220 = vmatprep.mubr.msk.f32.mxu0 %vm46_vm0, %v5033_v41  ;;  %4501 = vmatpush3.bf16.msra.mxu0 %v4498_v57 }
 0x9a7   :  { %v1514_v43 = vpop.f32.mrb[12].mxu1 }
 0x9a8   :  { %v4211_v45 = vpop.f32.mrb[13].mxu1 }
 0x9ab   :  { %v1441_v46 = vpop.f32.mrb[20].mxu0 }
 0x9ac   :  { %v1515_v47 = vadd.f32 %v1514_v43, %v1441_v46  ;;  %v4204_v48 = vpop.f32.mrb[21].mxu0 }
 0x9ae   :  { %v1526_v49 = vadd.f32 %v3784_v6, %v1515_v47  ;;  %v4506_v6 = vpack.c.bf16 %v1724_v4, %v1723_v3 }
 0x9b0   :  { %v1528_v50 = vadd.f32 %v1526_v49, %v4826_v12  ;;  %v1578_v12 = vld [vmem:[%s5463_s5 + $0x10] sm:$0xff]  ;;  %4507 = vmatprep.subr.bf16.mxu1 %v4506_v6 }
 0x9b1   :  { %v4502_v59 = vpack.c.bf16 %v1579_v58, %v1578_v12  ;;  %4509 = vmatpush3.bf16.msra.mxu1 %v4506_v6 }
 0x9b2   :  { %v1536_v51 = vsel %vm46_vm0, %v1528_v50, 0.0  ;;  %4511 = vmatprep.subr.bf16.mxu1 %v4510_v9 }
 0x9b3   :  { %1537 = vadd.xlane.f32.xlu1 %v1536_v51  ;;  %4503 = vmatprep.subr.bf16.mxu0 %v4502_v59 }
 0x9b4   :  { %4505 = vmatpush3.bf16.msra.mxu0 %v4502_v59 }
 0x9b5   :  { %4513 = vmatpush3.bf16.msra.mxu1 %v4510_v9 }
 0x9b6   :  { %4515 = vmatprep.subr.bf16.mxu1 %v4514_v13 }
 0x9b9   :  { %4517 = vmatpush3.bf16.msra.mxu1 %v4514_v13 }
 0x9ba   :  { %4519 = vmatprep.subr.bf16.mxu1 %v4518_v16 }
 0x9bd   :  { %4521 = vmatpush3.bf16.msra.mxu1 %v4518_v16 }
 0x9be   :  { %4523 = vmatprep.subr.bf16.mxu1 %v4522_v19 }
 0x9c1   :  { %4525 = vmatpush3.bf16.msra.mxu1 %v4522_v19 }
 0x9c2   :  { %4527 = vmatprep.subr.bf16.mxu1 %v4526_v22 }
 0x9c5   :  { %4529 = vmatpush3.bf16.msra.mxu1 %v4526_v22 }
 0x9c6   :  { %4531 = vmatprep.subr.bf16.mxu1 %v4530_v24 }
 0x9c9   :  { %4533 = vmatpush3.bf16.msra.mxu1 %v4530_v24 }
 0x9ca   :  { %4535 = vmatprep.subr.bf16.mxu1 %v4534_v28 }
 0x9cd   :  { %4537 = vmatpush3.bf16.msra.mxu1 %v4534_v28 }
 0xa40   :  { %v1538_v33 = vpop.xlane.xlu1 %1537 }
 0xa41   :  { %v1541_v39 = vmul.f32 0.03125, %v1538_v33 }
 0xa43   :  { %v1543_v52 = vsub.f32 %v1528_v50, %v1541_v39 }
 0xa45   :  { %v1545_v54 = vmul.f32 %v1543_v52, %v1543_v52 }
 0xa47   :  { %v1549_v44 = vsel %vm46_vm0, %v1545_v54, 0.0 }
 0xa48   :  { %1550 = vadd.xlane.f32.xlu1 %v1549_v44 }
 0xad5   :  { %v1551_v60 = vpop.xlane.xlu1 %1550 }
 0xad6   :  { %v1553_v61 = vmul.f32 0.03125, %v1551_v60 }
 0xad8   :  { %v1555_v62 = vadd.f32 1e-12, %v1553_v61 }
 0xada   :  { %4663 = vrsqrt.f32 %v1555_v62 }
 0xae4   :  { %v4664_v63 = vpop.eup %4663 }
 0xae5   :  { %v1559_v0 = vmul.f32 %v4664_v63, %v1543_v52 }
 0xae7   :  { %v1567_v1 = vmul.f32 %v3787_v32, %v1559_v0 }
 0xae9   :  { %v5053_v2 = vadd.f32 %v3788_v38, %v1567_v1 }
 0xaeb   :  { %4221 = vmatmul.mubr.msk.f32.vlgmr.msra.gmra.mrb[22].mxu0 %vm46_vm0, %v5053_v2 }
 0xbbe   :  { %v4222_v31 = vpop.f32.mrb[22].mxu0 }
 0xbbf   :  { %v1665_v32 = vadd.f32 %v4222_v31, %v3789_v30  ;;  %v1659_v34 = vpop.f32.mrb[23].mxu0 }
 0xbc0   :  { %v1660_v35 = vadd.f32 %v3789_v30, %v1659_v34 }
 0xbc1   :  { %v1672_v37 = vmul.f32 0.70710677, %v1665_v32  ;;  %v1669_v23 = vmul.f32 0.5, %v1665_v32 }
 0xbc2   :  { %v1671_v38 = vmul.f32 0.70710677, %v1660_v35  ;;  %v1668_v22 = vmul.f32 0.5, %v1660_v35 }
 0xbc3   :  { %v1678_v40 = vand.u32 2147483647, %v1672_v37  ;;  %vm1674_vm4 = vcmp.ge.f32.partialorder %v1672_v37, 0.0 }
 0xbc4   :  { %v1677_v42 = vand.u32 2147483647, %v1671_v38  ;;  %vm1673_vm5 = vcmp.ge.f32.partialorder %v1671_v38, 0.0  ;;  %v1676_v16 = vsel %vm1674_vm4, 1.0, %v4736_v15 }
 0xbc5   :  { %v1680_v43 = vmul.f32 0.3275911, %v1678_v40  ;;  %v1706_v48 = vsub.f32 0.0, %v1678_v40  ;;  %v1675_v19 = vsel %vm1673_vm5, 1.0, %v4736_v15 }
 0xbc6   :  { %v1679_v45 = vmul.f32 0.3275911, %v1677_v42  ;;  %v1705_v49 = vsub.f32 0.0, %v1677_v42 }
 0xbc7   :  { %v1682_v46 = vadd.f32 1.0, %v1680_v43  ;;  %v1708_v51 = vmul.f32 %v1706_v48, %v1678_v40 }
 0xbc8   :  { %v1681_v47 = vadd.f32 1.0, %v1679_v45  ;;  %v1707_v52 = vmul.f32 %v1705_v49, %v1677_v42 }
 0xbc9   :  { %4665 = vrcp.f32 %v1682_v46  ;;  %v1711_v55 = vmul.f32 1.442695, %v1708_v51  ;;  %v3799_v51 = vld [vmem:[%s5460_s2 + $0xc8] sm:$0xff] }
 0xbca   :  { %4667 = vrcp.f32 %v1681_v47  ;;  %v1709_v12 = vmul.f32 1.442695, %v1707_v52  ;;  %v3831_v52 = vld [vmem:[%s5460_s2 + $0x148] sm:$0xff] }
 0xbcb   :  { %4669 = vpow2.f32 %v1711_v55  ;;  %v3801_v55 = vld [vmem:[%s5460_s2 + $0xd8] sm:$0xff] }
 0xbcc   :  { %4671 = vpow2.f32 %v1709_v12  ;;  %v3833_v12 = vld [vmem:[%s5460_s2 + $0x158] sm:$0xff] }
 0xbd3   :  { %v4666_v50 = vpop.eup %4665 }
 0xbd4   :  { %v4668_v33 = vpop.eup %4667  ;;  %v1688_v39 = vmul.f32 1.0614054, %v4666_v50 }
 0xbd5   :  { %v1687_v54 = vmul.f32 1.0614054, %v4668_v33  ;;  %v4670_v8 = vpop.eup %4669 }
 0xbd6   :  { %v1690_v44 = vadd.f32 -1.4531521, %v1688_v39  ;;  %v4672_v10 = vpop.eup %4671  ;;  %v3830_v39 = vld [vmem:[%s5460_s2 + $0x140] sm:$0xff] }
 0xbd7   :  { %v1689_v56 = vadd.f32 -1.4531521, %v1687_v54  ;;  %v4570_v54 = vpack.c.bf16 %v3831_v52, %v3830_v39 }
 0xbd8   :  { %v1692_v57 = vmul.f32 %v4666_v50, %v1690_v44  ;;  %v3800_v44 = vld [vmem:[%s5460_s2 + $0xd0] sm:$0xff] }
 0xbd9   :  { %v1691_v58 = vmul.f32 %v4668_v33, %v1689_v56  ;;  %4571 = vmatprep.subr.bf16.mxu1 %v4570_v54  ;;  %v4542_v56 = vpack.c.bf16 %v3801_v55, %v3800_v44 }
 0xbda   :  { %v1694_v59 = vadd.f32 1.4214138, %v1692_v57  ;;  %v3832_v57 = vld [vmem:[%s5460_s2 + $0x150] sm:$0xff] }
 0xbdb   :  { %v1693_v60 = vadd.f32 1.4214138, %v1691_v58  ;;  %v4574_v58 = vpack.c.bf16 %v3833_v12, %v3832_v57 }
 0xbdc   :  { %v1696_v61 = vmul.f32 %v4666_v50, %v1694_v59  ;;  %v3806_v59 = vld [vmem:[%s5460_s2 + $0xe0] sm:$0xff] }
 0xbdd   :  { %v1695_v62 = vmul.f32 %v4668_v33, %v1693_v60  ;;  %v3807_v60 = vld [vmem:[%s5460_s2 + $0xe8] sm:$0xff] }
 0xbde   :  { %v1698_v63 = vadd.f32 -0.28449672, %v1696_v61  ;;  %v4546_v61 = vpack.c.bf16 %v3807_v60, %v3806_v59  ;;  %v3827_v60 = vld [vmem:[%s5461_s3 + $0x9] ss:$0 sm:$0xff] }
 0xbdf   :  { %v1697_v0 = vadd.f32 -0.28449672, %v1695_v62 }
 0xbe0   :  { %v1700_v1 = vmul.f32 %v4666_v50, %v1698_v63 }
 0xbe1   :  { %v1699_v3 = vmul.f32 %v4668_v33, %v1697_v0 }
 0xbe2   :  { %v1702_v4 = vadd.f32 0.2548296, %v1700_v1 }
 0xbe3   :  { %v1701_v6 = vadd.f32 0.2548296, %v1699_v3 }
 0xbe4   :  { %v1704_v7 = vmul.f32 %v4666_v50, %v1702_v4 }
 0xbe5   :  { %v1703_v9 = vmul.f32 %v4668_v33, %v1701_v6 }
 0xbe6   :  { %v1714_v11 = vmul.f32 %v4670_v8, %v1704_v7  ;;  %v3796_v7 = vld [vmem:[%s5466_s8 + $0x4] ss:$0 sm:$0xff] }
 0xbe7   :  { %v1713_v13 = vmul.f32 %v4672_v10, %v1703_v9 }
 0xbe8   :  { %v1716_v14 = vsub.f32 1.0, %v1714_v11  ;;  %v3797_v11 = vld [vmem:[%s5466_s8 + $0x5] ss:$0 sm:$0xff] }
 0xbe9   :  { %v1715_v17 = vsub.f32 1.0, %v1713_v13 }
 0xbea   :  { %v1718_v18 = vmul.f32 %v1716_v14, %v1676_v16  ;;  %v3808_v16 = vld [vmem:[%s5460_s2 + $0xf0] sm:$0xff] }
 0xbeb   :  { %v1717_v20 = vmul.f32 %v1715_v17, %v1675_v19  ;;  %v3809_v17 = vld [vmem:[%s5460_s2 + $0xf8] sm:$0xff] }
 0xbec   :  { %v1720_v21 = vadd.f32 1.0, %v1718_v18 }
 0xbed   :  { %v1719_v5 = vadd.f32 1.0, %v1717_v20  ;;  %v4550_v20 = vpack.c.bf16 %v3809_v17, %v3808_v16 }
 0xbee   :  { %v1722_v25 = vmul.f32 %v1720_v21, %v1669_v23  ;;  %v3814_v21 = vld [vmem:[%s5460_s2 + $0x100] sm:$0xff]  ;;  %v3816_v23 = vld [vmem:[%s5460_s2 + $0x110] sm:$0xff] }
 0xbef   :  { %v1721_v24 = vmul.f32 %v1719_v5, %v1668_v22  ;;  %v3815_v22 = vld [vmem:[%s5460_s2 + $0x108] sm:$0xff] }
 0xbf0   :  { %v4554_v5 = vpack.c.bf16 %v3815_v22, %v3814_v21 }
 0xbf1   :  { %4255 = vmatprep.mubr.f32.mxu1 %v1721_v24  ;;  %v3817_v24 = vld [vmem:[%s5460_s2 + $0x118] sm:$0xff] }
 0xbf2   :  { %4256 = vmatmul.mubr.f32.vlgmr.msra.gmra.mrb[14].mxu1 %v1722_v25  ;;  %v4558_v25 = vpack.c.bf16 %v3817_v24, %v3816_v23 }
 0xbf3   :  { %4573 = vmatpush3.bf16.msra.mxu1 %v4570_v54 }
 0xbf4   :  { %4575 = vmatprep.subr.bf16.mxu1 %v4574_v58 }
 0xbf7   :  { %4577 = vmatpush3.bf16.msra.mxu1 %v4574_v58 }
 0xbf8   :  { %4324 = vmatprep.subr.mxu1 %v4733_v26 }
 0xcc5   :  { %v4257_v28 = vpop.f32.mrb[14].mxu1 }
 0xcc6   :  { %v1819_v30 = vadd.f32 %v4257_v28, %v3793_v27  ;;  %v1813_v31 = vpop.f32.mrb[15].mxu1  ;;  %v3823_v28 = vld [vmem:[%s5460_s2 + $0x128] sm:$0xff] }
 0xcc7   :  { %v1814_v34 = vadd.f32 %v3793_v27, %v1813_v31  ;;  %v3822_v27 = vld [vmem:[%s5460_s2 + $0x120] sm:$0xff]  ;;  %v3824_v31 = vld [vmem:[%s5460_s2 + $0x130] sm:$0xff] }
 0xcc8   :  { %v1823_v37 = vadd.f32 %v1819_v30, %v5053_v2  ;;  %v4562_v30 = vpack.c.bf16 %v3823_v28, %v3822_v27 }
 0xcc9   :  { %v1822_v38 = vadd.f32 %v1814_v34, %v5033_v41  ;;  %v3798_v41 = vld [vmem:[%s5460_s2 + $0xc0] sm:$0xff]  ;;  %v3825_v34 = vld [vmem:[%s5460_s2 + $0x138] sm:$0xff] }
 0xcca   :  { %v1831_v35 = vsel %vm46_vm0, %v1823_v37, 0.0  ;;  %v4538_v33 = vpack.c.bf16 %v3799_v51, %v3798_v41 }
 0xccb   :  { %1832 = vadd.xlane.f32.xlu1 %v1831_v35  ;;  %v1828_v32 = vsel %vm46_vm0, %v1822_v38, 0.0  ;;  %v3839_v35 = vld [vmem:[%s5460_s2 + $0x168] sm:$0xff] }
 0xccc   :  { %1829 = vadd.xlane.f32.xlu0 %v1828_v32  ;;  %4539 = vmatprep.subr.bf16.mxu0 %v4538_v33 }
 0xccd   :  { %4541 = vmatpush3.bf16.msra.mxu0 %v4538_v33  ;;  %v3811_v33 = vld [vmem:[%s5461_s3 + $0x7] ss:$0 sm:$0xff] }
 0xcce   :  { %4543 = vmatprep.subr.bf16.mxu0 %v4542_v56 }
 0xcd1   :  { %4545 = vmatpush3.bf16.msra.mxu0 %v4542_v56  ;;  %v3819_v56 = vld [vmem:[%s5461_s3 + $0x8] ss:$0 sm:$0xff] }
 0xcd2   :  { %4547 = vmatprep.subr.bf16.mxu0 %v4546_v61 }
 0xd58   :  { %v1833_v40 = vpop.xlane.xlu1 %1832 }
 0xd59   :  { %v1835_v42 = vmul.f32 0.03125, %v1833_v40  ;;  %v1830_v43 = vpop.xlane.xlu0 %1829  ;;  %v3840_v40 = vld [vmem:[%s5460_s2 + $0x170] sm:$0xff] }
 0xd5a   :  { %v1834_v45 = vmul.f32 0.03125, %v1830_v43 }
 0xd5b   :  { %v1837_v46 = vsub.f32 %v1823_v37, %v1835_v42  ;;  %v4566_v37 = vpack.c.bf16 %v3825_v34, %v3824_v31  ;;  %v3841_v42 = vld [vmem:[%s5460_s2 + $0x178] sm:$0xff] }
 0xd5c   :  { %v1836_v47 = vsub.f32 %v1822_v38, %v1834_v45  ;;  %v3838_v38 = vld [vmem:[%s5460_s2 + $0x160] sm:$0xff]  ;;  %v4582_v43 = vpack.c.bf16 %v3841_v42, %v3840_v40  ;;  %v3850_v40 = vld [vmem:[%s5462_s4 + $0x28] sm:$0xff] }
 0xd5d   :  { %v1839_v48 = vmul.f32 %v1837_v46, %v1837_v46  ;;  %v4578_v32 = vpack.c.bf16 %v3839_v35, %v3838_v38  ;;  %v3803_v45 = vld [vmem:[%s5461_s3 + $0x6] ss:$0 sm:$0xff] }
 0xd5e   :  { %v1838_v49 = vmul.f32 %v1836_v47, %v1836_v47 }
 0xd5f   :  { %v1843_v50 = vsel %vm46_vm0, %v1839_v48, 0.0 }
 0xd60   :  { %1844 = vadd.xlane.f32.xlu1 %v1843_v50  ;;  %v1840_v2 = vsel %vm46_vm0, %v1838_v49, 0.0 }
 0xd61   :  { %1841 = vadd.xlane.f32.xlu0 %v1840_v2 }
 0xded   :  { %v1845_v62 = vpop.xlane.xlu1 %1844 }
 0xdee   :  { %v1847_v63 = vmul.f32 0.03125, %v1845_v62  ;;  %v1842_v0 = vpop.xlane.xlu0 %1841 }
 0xdef   :  { %v1846_v1 = vmul.f32 0.03125, %v1842_v0 }
 0xdf0   :  { %v1849_v3 = vadd.f32 1e-12, %v1847_v63 }
 0xdf1   :  { %v1848_v4 = vadd.f32 1e-12, %v1846_v1  ;;  %v3843_v1 = vld [vmem:[%s5461_s3 + $0xb] ss:$0 sm:$0xff] }
 0xdf2   :  { %4673 = vrsqrt.f32 %v1849_v3 }
 0xdf3   :  { %4675 = vrsqrt.f32 %v1848_v4 }
 0xdfc   :  { %v4674_v6 = vpop.eup %4673 }
 0xdfd   :  { %v4676_v8 = vpop.eup %4675  ;;  %v1853_v9 = vmul.f32 %v4674_v6, %v1837_v46  ;;  %v3835_v46 = vld [vmem:[%s5461_s3 + $0xa] ss:$0 sm:$0xff] }
 0xdfe   :  { %v1852_v10 = vmul.f32 %v4676_v8, %v1836_v47 }
 0xdff   :  { %v1861_v13 = vmul.f32 %v3796_v7, %v1853_v9 }
 0xe00   :  { %v1860_v14 = vmul.f32 %v3796_v7, %v1852_v10 }
 0xe01   :  { %v5164_v19 = vadd.f32 %v3797_v11, %v1861_v13 }
 0xe02   :  { %v5162_v18 = vadd.f32 %v3797_v11, %v1860_v14 }
 0xe04   :  { %4266 = vmatprep.mubr.msk.f32.mxu0 %vm46_vm0, %v5162_v18  ;;  %4310 = vmatprep.mubr.msk.f32.mxu1 %vm46_vm0, %v5162_v18 }
 0xe05   :  { %4267 = vmatmul.mubr.msk.f32.vlgmr.msra.gmra.mrb[24].mxu0 %vm46_vm0, %v5164_v19  ;;  %4311 = vmatmul.mubr.msk.f32.vlgmr.msra.gmra.mrb[16].mxu1 %vm46_vm0, %v5164_v19 }
 0xe06   :  { %4549 = vmatpush3.bf16.msra.mxu0 %v4546_v61  ;;  %4277 = vmatprep.mubr.msk.f32.mxu0 %vm46_vm0, %v5162_v18 }
 0xe07   :  { %4551 = vmatprep.subr.bf16.mxu0 %v4550_v20  ;;  %4326 = vmatprep.mubr.msk.f32.mxu1 %vm4734_vm1, %v4733_v26 }
 0xe0a   :  { %4553 = vmatpush3.bf16.msra.mxu0 %v4550_v20 }
 0xe0b   :  { %4555 = vmatprep.subr.bf16.mxu0 %v4554_v5 }
 0xe0d   :  { %4278 = vmatmul.mubr.msk.f32.vlgmr.msra.gmra.mrb[26].mxu0 %vm46_vm0, %v5164_v19 }
 0xe0e   :  { %4557 = vmatpush3.bf16.msra.mxu0 %v4554_v5  ;;  %4288 = vmatprep.mubr.msk.f32.mxu0 %vm46_vm0, %v5162_v18 }
 0xe0f   :  { %4559 = vmatprep.subr.bf16.mxu0 %v4558_v25 }
 0xe12   :  { %4561 = vmatpush3.bf16.msra.mxu0 %v4558_v25 }
 0xe13   :  { %4563 = vmatprep.subr.bf16.mxu0 %v4562_v30 }
 0xe15   :  { %4289 = vmatmul.mubr.msk.f32.vlgmr.msra.gmra.mrb[28].mxu0 %vm46_vm0, %v5164_v19 }
 0xe16   :  { %4565 = vmatpush3.bf16.msra.mxu0 %v4562_v30  ;;  %4299 = vmatprep.mubr.msk.f32.mxu0 %vm46_vm0, %v5162_v18 }
 0xe17   :  { %4567 = vmatprep.subr.bf16.mxu0 %v4566_v37 }
 0xe1a   :  { %4569 = vmatpush3.bf16.msra.mxu0 %v4566_v37 }
 0xe1b   :  { %4579 = vmatprep.subr.bf16.mxu0 %v4578_v32 }
 0xe1d   :  { %4300 = vmatmul.mubr.msk.f32.vlgmr.msra.gmra.mrb[30].mxu0 %vm46_vm0, %v5164_v19 }
 0xe1e   :  { %4581 = vmatpush3.bf16.msra.mxu0 %v4578_v32  ;;  %4321 = vmatprep.mubr.msk.f32.mxu0 %vm46_vm0, %v5162_v18  ;;  %v3849_v32 = vld [vmem:[%s5462_s4 + $0x20] sm:$0xff] }
 0xe1f   :  { %4583 = vmatprep.subr.bf16.mxu0 %v4582_v43 }
 0xe22   :  { %4585 = vmatpush3.bf16.msra.mxu0 %v4582_v43  ;;  %v5288_v43 = vpack.c.bf16 %v3850_v40, %v3849_v32  ;;  %v3871_v32 = vld [vmem:[%s5466_s8 + $0x8] ss:$0 sm:$0xff] }
 0xe23   :  { %4334 = vmatprep.subr.mxu0 %v4733_v26 }
 0xe25   :  { %4322 = vmatmul.mubr.msk.f32.vlgmr.msra.gmra.mrb[32].mxu0 %vm46_vm0, %v5164_v19 }
 0xe26   :  { %4336 = vmatprep.mubr.msk.f32.mxu0 %vm4734_vm1, %v4733_v26 }
 0xed8   :  { %v4268_v47 = vpop.f32.mrb[24].mxu0  ;;  %v4312_v48 = vpop.f32.mrb[16].mxu1 }
 0xed9   :  { %v5237_v49 = vadd.f32 %v4268_v47, %v3803_v45  ;;  %v5239_v50 = vadd.f32 %v4312_v48, %v3835_v46  ;;  %v1955_v2 = vpop.f32.mrb[25].mxu0  ;;  %v2307_v41 = vpop.f32.mrb[17].mxu1  ;;  %v3855_v47 = vld [vmem:[%s5462_s4 + $0x38] sm:$0xff] }
 0xeda   :  { %v2308_v51 = vadd.f32 %v3835_v46, %v2307_v41  ;;  %v1956_v55 = vadd.f32 %v3803_v45, %v1955_v2  ;;  %v3854_v46 = vld [vmem:[%s5462_s4 + $0x30] sm:$0xff]  ;;  %s4709_s4 = scalar_lea.vmem %s3712_s22, 256 }
 0xedb   :  { %v4587_v48 = vpack.c.bf16 %v3855_v47, %v3854_v46  ;;  %p4710_p0 = scmp.ne.s32.totalorder %s3712_s22, %s4709_s4  ;;  %p4715_p2 = scmp.lt.s32.totalorder %s4709_s4, %s4709_s4 }
 0xedc   :  { %4335 = vmatpush3.xpose.msk.msra.mxu0 %vm569_vm2, %v2308_v51 }
 0xedd   :  { %4586 = vmatprep.subr.bf16.mxu0 %v4735_v36  ;;  %p4716_p3 = por %p4715_p2, %p4714_p1 }
 0xedf   :  { %p4717_p4 = pnand %p4716_p3, %p4710_p0 }
 0xee0   :  { %v4279_v39 = vpop.f32.mrb[26].mxu0 }
 0xee1   :  { %v5246_v52 = vadd.f32 %v4279_v39, %v3811_v33  ;;  %v2043_v54 = vpop.f32.mrb[27].mxu0 }
 0xee2   :  { %v2044_v44 = vadd.f32 %v3811_v33, %v2043_v54 }
 0xee4   :  { %4325 = vmatpush3.xpose.msk.msra.mxu1 %vm569_vm2, %v2044_v44 }
 0xee5   :  { %4329 = vmatprep.subr.mxu1 %v4733_v26 }
 0xee7   :  { %4327 = vmatmul.mubr.msk.f32.vlgmr.msra.gmra.mrb[18].mxu1 %vm569_vm2, %v1956_v55 }
 0xee8   :  { %v4290_v57 = vpop.f32.mrb[28].mxu0  ;;  %4331 = vmatprep.mubr.msk.f32.mxu1 %vm4734_vm1, %v4733_v26 }
 0xee9   :  { %v5256_v12 = vadd.f32 %v4290_v57, %v3819_v56  ;;  %v2131_v58 = vpop.f32.mrb[29].mxu0 }
 0xeea   :  { %v2132_v59 = vadd.f32 %v3819_v56, %v2131_v58 }
 0xeec   :  { %4330 = vmatpush3.msra.mxu1 %v2132_v59 }
 0xeed   :  { %4339 = vmatprep.subr.mxu1 %v4733_v26 }
 0xef0   :  { %v4301_v61 = vpop.f32.mrb[30].mxu0 }
 0xef1   :  { %v5262_v62 = vadd.f32 %v4301_v61, %v3827_v60  ;;  %v2219_v63 = vpop.f32.mrb[31].mxu0 }
 0xef2   :  { %v2220_v0 = vadd.f32 %v3827_v60, %v2219_v63 }
 0xef4   :  { %4337 = vmatmul.mubr.msk.f32.vlgmr.msra.gmra.mrb[34].mxu0 %vm569_vm2, %v2220_v0 }
 0xef5   :  { %4348 = vmatprep.mubr.msk.f32.mxu0 %vm4734_vm1, %v4733_v26  ;;  %4588 = vmatpush3.bf16.msra.mxu0 %v4587_v48 }
 0xef6   :  { %4358 = vmatprep.subr.mxu0 %v4733_v26 }
 0xef8   :  { %v4323_v3 = vpop.f32.mrb[32].mxu0 }
 0xef9   :  { %v5270_v4 = vadd.f32 %v4323_v3, %v3843_v1  ;;  %v2395_v6 = vpop.f32.mrb[33].mxu0 }
 0xefa   :  { %v2396_v38 = vadd.f32 %v3843_v1, %v2395_v6 }
 0xfba   :  { %v2476_v7 = vpop.f32.mrb[18].mxu1 }
 0xfbb   :  { %v2480_v8 = vmul.f32 0.25, %v2476_v7  ;;  %v4328_v9 = vpop.f32.mrb[19].mxu1 }
 0xfbd   :  { %v2481_v10 = vadd.f32 %v2480_v8, %v4914_v53  ;;  %v3867_v8 = vld [vmem:[%s5466_s8 + $0x6] ss:$0 sm:$0xff] }
 0xfbf   :  { %v2482_v11 = vsel %vm648_vm3, %v2481_v10, -inf }
 0xfc0   :  { %2483 = vmax.xlane.f32.xlu0 %v2482_v11 }
 0xfc7   :  { %v2641_v13 = vpop.f32.mrb[34].mxu0 }
 0xfc8   :  { %v2645_v14 = vmul.f32 0.25, %v2641_v13  ;;  %v4338_v16 = vpop.f32.mrb[35].mxu0 }
 0xfca   :  { %v2646_v17 = vadd.f32 %v2645_v14, %v4914_v53 }
 0xfcc   :  { %v2647_v20 = vsel %vm648_vm3, %v2646_v17, -inf }
 0xfcd   :  { %2648 = vmax.xlane.f32.xlu1 %v2647_v20 }
0x104d   :  { %v2484_v21 = vpop.xlane.xlu0 %2483 }
0x104e   :  { %v2485_v22 = vsub.f32 %v2481_v10, %v2484_v21 }
0x1050   :  { %v2486_v5 = vmul.f32 1.442695, %v2485_v22 }
0x1052   :  { %4677 = vpow2.f32 %v2486_v5 }
0x105a   :  { %v2649_v23 = vpop.xlane.xlu1 %2648 }
0x105b   :  { %v2650_v24 = vsub.f32 %v2646_v17, %v2649_v23 }
0x105c   :  { %v4678_v25 = vpop.eup %4677 }
0x105d   :  { %v2651_v27 = vmul.f32 1.442695, %v2650_v24  ;;  %v2488_v28 = vsel %vm648_vm3, %v4678_v25, 0.0 }
0x105e   :  { %2489 = vadd.xlane.f32.xlu0 %v2488_v28 }
0x105f   :  { %4679 = vpow2.f32 %v2651_v27 }
0x1069   :  { %v4680_v30 = vpop.eup %4679 }
0x106a   :  { %v2653_v31 = vsel %vm648_vm3, %v4680_v30, 0.0 }
0x106b   :  { %2654 = vadd.xlane.f32.xlu1 %v2653_v31 }
0x10eb   :  { %v2490_v53 = vpop.xlane.xlu0 %2489 }
0x10ec   :  { %4681 = vrcp.f32 %v2490_v53 }
0x10f6   :  { %v4682_v34 = vpop.eup %4681 }
0x10f7   :  { %v2492_v37 = vmul.f32 %v4682_v34, %v4678_v25 }
0x10f8   :  { %v2655_v35 = vpop.xlane.xlu1 %2654 }
0x10f9   :  { %4683 = vrcp.f32 %v2655_v35  ;;  %4332 = vmatmul.mubr.msk.f32.vlgmr.msra.gmra.mrb[20].mxu1 %vm648_vm3, %v2492_v37 }
0x10fa   :  { %4340 = vmatpush3.msra.mxu1 %v2396_v38  ;;  %4341 = vmatprep.mubr.msk.f32.mxu1 %vm4734_vm1, %v4733_v26 }
0x10fb   :  { %4589 = vmatprep.subr.bf16.mxu1 %v4735_v36 }
0x1103   :  { %v4684_v42 = vpop.eup %4683 }
0x1104   :  { %v2657_v45 = vmul.f32 %v4684_v42, %v4680_v30 }
0x1106   :  { %4342 = vmatmul.mubr.msk.f32.vlgmr.msra.gmra.mrb[22].mxu1 %vm648_vm3, %v2657_v45 }
0x1107   :  { %4591 = vmatpush3.bf16.msra.mxu1 %v5288_v43  ;;  %4355 = vmatprep.mubr.msk.f32.mxu1 %vm4734_vm1, %v4733_v26 }
0x1108   :  { %4363 = vmatprep.subr.mxu1 %v4733_v26 }
0x11cc   :  { %v2562_v2 = vpop.f32.mrb[20].mxu1 }
0x11cd   :  { %v4333_v41 = vpop.f32.mrb[21].mxu1  ;;  %4356 = vmatmul.mubr.msk.f32.vlgmr.msra.gmra.mrb[24].mxu1 %vm569_vm2, %v2562_v2 }
0x11ce   :  { %4364 = vmatpush3.msra.mxu1 %v5256_v12  ;;  %4365 = vmatprep.mubr.msk.f32.mxu1 %vm4734_vm1, %v4733_v26 }
0x11cf   :  { %4373 = vmatprep.subr.mxu1 %v4733_v26 }
0x11d9   :  { %v2727_v51 = vpop.f32.mrb[22].mxu1 }
0x11da   :  { %v4343_v33 = vpop.f32.mrb[23].mxu1  ;;  %4349 = vmatmul.mubr.msk.f32.vlgmr.msra.gmra.mrb[36].mxu0 %vm569_vm2, %v2727_v51 }
0x11db   :  { %4359 = vmatpush3.xpose.msk.msra.mxu0 %vm569_vm2, %v5246_v52  ;;  %4360 = vmatprep.mubr.msk.f32.mxu0 %vm4734_vm1, %v4733_v26 }
0x11dc   :  { %4368 = vmatprep.subr.mxu0 %v4733_v26 }
0x11de   :  { %4361 = vmatmul.mubr.msk.f32.vlgmr.msra.gmra.mrb[38].mxu0 %vm569_vm2, %v5237_v49 }
0x11df   :  { %4369 = vmatpush3.xpose.msk.msra.mxu0 %vm569_vm2, %v5239_v50  ;;  %4370 = vmatprep.mubr.msk.f32.mxu0 %vm4734_vm1, %v4733_v26 }
0x11e0   :  { %4592 = vmatprep.subr.bf16.mxu0 %v4735_v36 }
0x11e2   :  { %4371 = vmatmul.mubr.msk.f32.vlgmr.msra.gmra.mrb[40].mxu0 %vm569_vm2, %v5262_v62 }
0x11e3   :  { %4594 = vmatpush3.bf16.msra.mxu0 %v4587_v48  ;;  %4382 = vmatprep.mubr.msk.f32.mxu0 %vm4734_vm1, %v4733_v26 }
0x12a0   :  { %v2876_v39 = vpop.f32.mrb[24].mxu1 }
0x12a1   :  { %v4357_v52 = vpop.f32.mrb[25].mxu1 }
0x12ad   :  { %v2803_v54 = vpop.f32.mrb[36].mxu0 }
0x12ae   :  { %v2877_v44 = vadd.f32 %v2876_v39, %v2803_v54  ;;  %v4350_v49 = vpop.f32.mrb[37].mxu0 }
0x12af   :  { %v3872_v49 = vld [vmem:[%s5463_s5 + $0x20] sm:$0xff] }
0x12b0   :  { %v3358_v9 = vadd.f32 %v3867_v8, %v2877_v44 }
0x12b1   :  { %v2952_v55 = vpop.f32.mrb[38].mxu0 }
0x12b2   :  { %v2956_v56 = vmul.f32 0.25, %v2952_v55  ;;  %v4362_v50 = vpop.f32.mrb[39].mxu0  ;;  %v3873_v55 = vld [vmem:[%s5463_s5 + $0x28] sm:$0xff] }
0x12b3   :  { %v3875_v50 = vld [vmem:[%s5463_s5 + $0x38] sm:$0xff] }
0x12b4   :  { %v2957_v57 = vadd.f32 %v5003_v29, %v2956_v56  ;;  %v4598_v56 = vpack.c.bf16 %v3873_v55, %v3872_v49 }
0x12b5   :  { %v3114_v12 = vpop.f32.mrb[40].mxu0 }
0x12b6   :  { %v3118_v58 = vmul.f32 0.25, %v3114_v12  ;;  %v4372_v59 = vpop.f32.mrb[41].mxu0  ;;  %v2958_v60 = vsel %vm648_vm3, %v2957_v57, -inf  ;;  %4599 = vmatprep.subr.bf16.mxu0 %v4598_v56 }
0x12b7   :  { %2959 = vmax.xlane.f32.xlu0 %v2958_v60 }
0x12b8   :  { %v3119_v61 = vadd.f32 %v5003_v29, %v3118_v58  ;;  %v3360_v29 = vadd.f32 %v3358_v9, %v5162_v18  ;;  %v3884_v9 = vld [vmem:[%s5465_s7 + $0xa0] sm:$0xff] }
0x12ba   :  { %v3120_v62 = vsel %vm648_vm3, %v3119_v61, -inf  ;;  %v3366_v16 = vsel %vm46_vm0, %v3360_v29, 0.0 }
0x12bb   :  { %3121 = vmax.xlane.f32.xlu1 %v3120_v62 }
0x1344   :  { %v2960_v63 = vpop.xlane.xlu0 %2959 }
0x1345   :  { %v2961_v0 = vsub.f32 %v2957_v57, %v2960_v63 }
0x1347   :  { %v2962_v1 = vmul.f32 1.442695, %v2961_v0  ;;  %v3880_v0 = vld [vmem:[%s5465_s7 + $0x80] sm:$0xff] }
0x1348   :  { %v3122_v3 = vpop.xlane.xlu1 %3121 }
0x1349   :  { %4685 = vpow2.f32 %v2962_v1  ;;  %v3123_v6 = vsub.f32 %v3119_v61, %v3122_v3  ;;  %v3881_v1 = vld [vmem:[%s5465_s7 + $0x88] sm:$0xff] }
0x134a   :  { %v4606_v3 = vpack.c.bf16 %v3881_v1, %v3880_v0 }
0x134b   :  { %v3124_v7 = vmul.f32 1.442695, %v3123_v6  ;;  %v3882_v6 = vld [vmem:[%s5465_s7 + $0x90] sm:$0xff] }
0x134d   :  { %4687 = vpow2.f32 %v3124_v7  ;;  %v3883_v7 = vld [vmem:[%s5465_s7 + $0x98] sm:$0xff] }
0x1353   :  { %v4686_v10 = vpop.eup %4685 }
0x1354   :  { %v2964_v11 = vsel %vm648_vm3, %v4686_v10, 0.0 }
0x1355   :  { %2965 = vadd.xlane.f32.xlu0 %v2964_v11 }
0x1357   :  { %v4688_v13 = vpop.eup %4687 }
0x1358   :  { %v3126_v14 = vsel %vm648_vm3, %v4688_v13, 0.0 }
0x1359   :  { %3127 = vadd.xlane.f32.xlu1 %v3126_v14  ;;  %3367 = vadd.xlane.f32.xlu0 %v3366_v16  ;;  %v3888_v16 = vld [vmem:[%s5465_s7 + $0xc0] sm:$0xff] }
0x13e2   :  { %v2966_v17 = vpop.xlane.xlu0 %2965 }
0x13e3   :  { %4689 = vrcp.f32 %v2966_v17  ;;  %v3889_v17 = vld [vmem:[%s5465_s7 + $0xc8] sm:$0xff] }
0x13e6   :  { %v3128_v20 = vpop.xlane.xlu1 %3127  ;;  %v3368_v21 = vpop.xlane.xlu0 %3367 }
0x13e7   :  { %4691 = vrcp.f32 %v3128_v20  ;;  %v3372_v22 = vmul.f32 0.03125, %v3368_v21  ;;  %v4622_v20 = vpack.c.bf16 %v3889_v17, %v3888_v16  ;;  %v3890_v21 = vld [vmem:[%s5465_s7 + $0xd0] sm:$0xff] }
0x13e9   :  { %v3374_v5 = vsub.f32 %v3360_v29, %v3372_v22  ;;  %v3886_v29 = vld [vmem:[%s5465_s7 + $0xb0] sm:$0xff]  ;;  %v3891_v22 = vld [vmem:[%s5465_s7 + $0xd8] sm:$0xff] }
0x13eb   :  { %v3376_v23 = vmul.f32 %v3374_v5, %v3374_v5 }
0x13ed   :  { %v4690_v24 = vpop.eup %4689  ;;  %v3378_v25 = vsel %vm46_vm0, %v3376_v23, 0.0  ;;  %v3892_v23 = vld [vmem:[%s5465_s7 + $0xe0] sm:$0xff] }
0x13ee   :  { %v2968_v18 = vmul.f32 %v4690_v24, %v4686_v10  ;;  %3379 = vadd.xlane.f32.xlu0 %v3378_v25  ;;  %v3885_v10 = vld [vmem:[%s5465_s7 + $0xa8] sm:$0xff] }
0x13ef   :  { %v4614_v11 = vpack.c.bf16 %v3885_v10, %v3884_v9  ;;  %v3893_v24 = vld [vmem:[%s5465_s7 + $0xe8] sm:$0xff] }
0x13f0   :  { %4366 = vmatmul.mubr.msk.f32.vlgmr.msra.gmra.mrb[26].mxu1 %vm648_vm3, %v2968_v18  ;;  %v4630_v25 = vpack.c.bf16 %v3893_v24, %v3892_v23  ;;  %v3894_v18 = vld [vmem:[%s5465_s7 + $0xf0] sm:$0xff]  ;;  %v3897_v23 = vld [vmem:[%s5466_s8 + $0x9] ss:$0 sm:$0xff] }
0x13f1   :  { %v4692_v27 = vpop.eup %4691  ;;  %4374 = vmatpush3.msra.mxu1 %v5270_v4  ;;  %4375 = vmatprep.mubr.msk.f32.mxu1 %vm4734_vm1, %v4733_v26  ;;  %v3870_v4 = vld [vmem:[%s5466_s8 + $0x7] ss:$0 sm:$0xff] }
0x13f2   :  { %v3130_v28 = vmul.f32 %v4692_v27, %v4688_v13  ;;  %4595 = vmatprep.subr.bf16.mxu1 %v4735_v36  ;;  %v3887_v13 = vld [vmem:[%s5465_s7 + $0xb8] sm:$0xff] }
0x13f3   :  { %v4618_v14 = vpack.c.bf16 %v3887_v13, %v3886_v29  ;;  %v3895_v27 = vld [vmem:[%s5465_s7 + $0xf8] sm:$0xff] }
0x13f4   :  { %4376 = vmatmul.mubr.msk.f32.vlgmr.msra.gmra.mrb[28].mxu1 %vm648_vm3, %v3130_v28  ;;  %v4634_v28 = vpack.c.bf16 %v3895_v27, %v3894_v18 }
0x13f5   :  { %4597 = vmatpush3.bf16.msra.mxu1 %v5288_v43  ;;  %4389 = vmatprep.mubr.msk.f32.mxu1 %vm4734_vm1, %v4733_v26 }
0x13f6   :  { %4607 = vmatprep.subr.bf16.mxu1 %v4606_v3 }
0x147b   :  { %v3380_v30 = vpop.xlane.xlu0 %3379 }
0x147c   :  { %v3384_v31 = vmul.f32 0.03125, %v3380_v30  ;;  %v3877_v30 = vld [vmem:[%s5464_s6 + $0x1] ss:$0 sm:$0xff] }
0x147e   :  { %v3386_v53 = vadd.f32 1e-12, %v3384_v31 }
0x1480   :  { %4693 = vrsqrt.f32 %v3386_v53 }
0x148a   :  { %v4694_v34 = vpop.eup %4693 }
0x148b   :  { %v3390_v37 = vmul.f32 %v4694_v34, %v3374_v5  ;;  %v4626_v5 = vpack.c.bf16 %v3891_v22, %v3890_v21 }
0x148d   :  { %v3398_v35 = vmul.f32 %v3870_v4, %v3390_v37 }
0x148f   :  { %v5352_v40 = vadd.f32 %v3871_v32, %v3398_v35 }
0x14c3   :  { %v3038_v38 = vpop.f32.mrb[26].mxu1 }
0x14c4   :  { %v4367_v36 = vpop.f32.mrb[27].mxu1  ;;  %4390 = vmatmul.mubr.msk.f32.vlgmr.msra.gmra.mrb[30].mxu1 %vm569_vm2, %v3038_v38 }
0x14c5   :  { %4609 = vmatpush3.bf16.msra.mxu1 %v4606_v3 }
0x14c7   :  { %v3200_v26 = vpop.f32.mrb[28].mxu1 }
0x14c8   :  { %v4377_v42 = vpop.f32.mrb[29].mxu1  ;;  %4383 = vmatmul.mubr.msk.f32.vlgmr.msra.gmra.mrb[42].mxu0 %vm569_vm2, %v3200_v26 }
0x14c9   :  { %4400 = vmatprep.mubr.msk.f32.mxu0 %vm46_vm0, %v5352_v40  ;;  %4601 = vmatpush3.bf16.msra.mxu0 %v4598_v56 }
0x1597   :  { %v3346_v43 = vpop.f32.mrb[30].mxu1 }
0x1598   :  { %v4391_v45 = vpop.f32.mrb[31].mxu1 }
0x159b   :  { %v3273_v46 = vpop.f32.mrb[42].mxu0 }
0x159c   :  { %v3347_v47 = vadd.f32 %v3346_v43, %v3273_v46  ;;  %v4384_v48 = vpop.f32.mrb[43].mxu0 }
0x159e   :  { %v3359_v2 = vadd.f32 %v3867_v8, %v3347_v47  ;;  %v4610_v8 = vpack.c.bf16 %v3883_v7, %v3882_v6 }
0x15a0   :  { %v3361_v41 = vadd.f32 %v3359_v2, %v5164_v19  ;;  %v3874_v19 = vld [vmem:[%s5463_s5 + $0x30] sm:$0xff]  ;;  %4611 = vmatprep.subr.bf16.mxu1 %v4610_v8 }
0x15a1   :  { %v4602_v57 = vpack.c.bf16 %v3875_v50, %v3874_v19  ;;  %4613 = vmatpush3.bf16.msra.mxu1 %v4610_v8 }
0x15a2   :  { %v3369_v51 = vsel %vm46_vm0, %v3361_v41, 0.0  ;;  %4615 = vmatprep.subr.bf16.mxu1 %v4614_v11 }
0x15a3   :  { %3370 = vadd.xlane.f32.xlu1 %v3369_v51  ;;  %4603 = vmatprep.subr.bf16.mxu0 %v4602_v57 }
0x15a4   :  { %4605 = vmatpush3.bf16.msra.mxu0 %v4602_v57 }
0x15a5   :  { %4617 = vmatpush3.bf16.msra.mxu1 %v4614_v11 }
0x15a6   :  { %4619 = vmatprep.subr.bf16.mxu1 %v4618_v14 }
0x15a9   :  { %4621 = vmatpush3.bf16.msra.mxu1 %v4618_v14 }
0x15aa   :  { %4623 = vmatprep.subr.bf16.mxu1 %v4622_v20 }
0x15ad   :  { %4625 = vmatpush3.bf16.msra.mxu1 %v4622_v20 }
0x15ae   :  { %4627 = vmatprep.subr.bf16.mxu1 %v4626_v5 }
0x15b1   :  { %4629 = vmatpush3.bf16.msra.mxu1 %v4626_v5 }
0x15b2   :  { %4631 = vmatprep.subr.bf16.mxu1 %v4630_v25 }
0x15b5   :  { %4633 = vmatpush3.bf16.msra.mxu1 %v4630_v25 }
0x15b6   :  { %4635 = vmatprep.subr.bf16.mxu1 %v4634_v28 }
0x15b9   :  { %4637 = vmatpush3.bf16.msra.mxu1 %v4634_v28 }
0x1630   :  { %v3371_v33 = vpop.xlane.xlu1 %3370 }
0x1631   :  { %v3373_v39 = vmul.f32 0.03125, %v3371_v33 }
0x1633   :  { %v3375_v52 = vsub.f32 %v3361_v41, %v3373_v39 }
0x1635   :  { %v3377_v54 = vmul.f32 %v3375_v52, %v3375_v52 }
0x1637   :  { %v3381_v44 = vsel %vm46_vm0, %v3377_v54, 0.0 }
0x1638   :  { %3382 = vadd.xlane.f32.xlu1 %v3381_v44 }
0x16c5   :  { %v3383_v12 = vpop.xlane.xlu1 %3382 }
0x16c6   :  { %v3385_v58 = vmul.f32 0.03125, %v3383_v12 }
0x16c8   :  { %v3387_v59 = vadd.f32 1e-12, %v3385_v58 }
0x16ca   :  { %4695 = vrsqrt.f32 %v3387_v59 }
0x16d4   :  { %v4696_v60 = vpop.eup %4695 }
0x16d5   :  { %v3391_v61 = vmul.f32 %v4696_v60, %v3375_v52 }
0x16d7   :  { %v3399_v62 = vmul.f32 %v3870_v4, %v3391_v61 }
0x16d9   :  { %v5372_v63 = vadd.f32 %v3871_v32, %v3399_v62 }
0x16db   :  { %4401 = vmatmul.mubr.msk.f32.vlgmr.msra.gmra.mrb[44].mxu0 %vm46_vm0, %v5372_v63 }
0x17ae   :  { %v4402_v31 = vpop.f32.mrb[44].mxu0 }
0x17af   :  { %v3499_v53 = vadd.f32 %v4402_v31, %v3877_v30  ;;  %v3493_v34 = vpop.f32.mrb[45].mxu0 }
0x17b0   :  { %v3494_v37 = vadd.f32 %v3877_v30, %v3493_v34 }
0x17b1   :  { %v3505_v4 = vmul.f32 0.70710677, %v3499_v53  ;;  %v3503_v21 = vmul.f32 0.5, %v3499_v53 }
0x17b2   :  { %v3504_v38 = vmul.f32 0.70710677, %v3494_v37  ;;  %v3502_v17 = vmul.f32 0.5, %v3494_v37 }
0x17b3   :  { %v3511_v35 = vand.u32 2147483647, %v3505_v4  ;;  %vm3507_vm6 = vcmp.ge.f32.partialorder %v3505_v4, 0.0 }
0x17b4   :  { %v3510_v36 = vand.u32 2147483647, %v3504_v38  ;;  %vm3506_vm7 = vcmp.ge.f32.partialorder %v3504_v38, 0.0  ;;  %v3509_v10 = vsel %vm3507_vm6, 1.0, %v4736_v15 }
0x17b5   :  { %v3513_v32 = vmul.f32 0.3275911, %v3511_v35  ;;  %v3539_v45 = vsub.f32 0.0, %v3511_v35  ;;  %v3508_v13 = vsel %vm3506_vm7, 1.0, %v4736_v15 }
0x17b6   :  { %v3512_v26 = vmul.f32 0.3275911, %v3510_v36  ;;  %v3538_v46 = vsub.f32 0.0, %v3510_v36 }
0x17b7   :  { %v3515_v42 = vadd.f32 1.0, %v3513_v32  ;;  %v3541_v48 = vmul.f32 %v3539_v45, %v3511_v35 }
0x17b8   :  { %v3514_v43 = vadd.f32 1.0, %v3512_v26  ;;  %v3540_v51 = vmul.f32 %v3538_v46, %v3510_v36 }
0x17b9   :  { %4697 = vrcp.f32 %v3515_v42  ;;  %v3544_v52 = vmul.f32 1.442695, %v3541_v48 }
0x17ba   :  { %4699 = vrcp.f32 %v3514_v43  ;;  %v3542_v49 = vmul.f32 1.442695, %v3540_v51 }
0x17bb   :  { %4701 = vpow2.f32 %v3544_v52 }
0x17bc   :  { %4703 = vpow2.f32 %v3542_v49 }
0x17c3   :  { %v4698_v47 = vpop.eup %4697 }
0x17c4   :  { %v4700_v2 = vpop.eup %4699  ;;  %v3521_v41 = vmul.f32 1.0614054, %v4698_v47 }
0x17c5   :  { %v3520_v33 = vmul.f32 1.0614054, %v4700_v2  ;;  %v4702_v1 = vpop.eup %4701 }
0x17c6   :  { %v3523_v39 = vadd.f32 -1.4531521, %v3521_v41  ;;  %v4704_v6 = vpop.eup %4703 }
0x17c7   :  { %v3522_v54 = vadd.f32 -1.4531521, %v3520_v33 }
0x17c8   :  { %v3525_v44 = vmul.f32 %v4698_v47, %v3523_v39  ;;  %v3901_v39 = vld [vmem:[%s5466_s8 + $0xb] ss:$0 sm:$0xff] }
0x17c9   :  { %v3524_v55 = vmul.f32 %v4700_v2, %v3522_v54 }
0x17ca   :  { %v3527_v56 = vadd.f32 1.4214138, %v3525_v44 }
0x17cb   :  { %v3526_v19 = vadd.f32 1.4214138, %v3524_v55 }
0x17cc   :  { %v3529_v50 = vmul.f32 %v4698_v47, %v3527_v56 }
0x17cd   :  { %v3528_v57 = vmul.f32 %v4700_v2, %v3526_v19 }
0x17ce   :  { %v3531_v12 = vadd.f32 -0.28449672, %v3529_v50 }
0x17cf   :  { %v3530_v58 = vadd.f32 -0.28449672, %v3528_v57 }
0x17d0   :  { %v3533_v59 = vmul.f32 %v4698_v47, %v3531_v12 }
0x17d1   :  { %v3532_v60 = vmul.f32 %v4700_v2, %v3530_v58 }
0x17d2   :  { %v3535_v61 = vadd.f32 0.2548296, %v3533_v59 }
0x17d3   :  { %v3534_v62 = vadd.f32 0.2548296, %v3532_v60 }
0x17d4   :  { %v3537_v0 = vmul.f32 %v4698_v47, %v3535_v61 }
0x17d5   :  { %v3536_v3 = vmul.f32 %v4700_v2, %v3534_v62  ;;  %v3900_v2 = vld [vmem:[%s5466_s8 + $0xa] ss:$0 sm:$0xff] }
0x17d6   :  { %v3547_v7 = vmul.f32 %v4702_v1, %v3537_v0 }
0x17d7   :  { %v3546_v8 = vmul.f32 %v4704_v6, %v3536_v3 }
0x17d8   :  { %v3549_v9 = vsub.f32 1.0, %v3547_v7 }
0x17d9   :  { %v3548_v11 = vsub.f32 1.0, %v3546_v8 }
0x17da   :  { %v3551_v29 = vmul.f32 %v3549_v9, %v3509_v10 }
0x17db   :  { %v3550_v14 = vmul.f32 %v3548_v11, %v3508_v13 }
0x17dc   :  { %v3553_v16 = vadd.f32 1.0, %v3551_v29 }
0x17dd   :  { %v3552_v20 = vadd.f32 1.0, %v3550_v14 }
0x17de   :  { %v3555_v5 = vmul.f32 %v3553_v16, %v3503_v21 }
0x17df   :  { %v3554_v22 = vmul.f32 %v3552_v20, %v3502_v17 }
0x17e1   :  { %4435 = vmatprep.mubr.f32.mxu1 %v3554_v22 }
0x17e2   :  { %4436 = vmatmul.mubr.f32.vlgmr.msra.gmra.mrb[32].mxu1 %v3555_v5 }
0x18b5   :  { %v4437_v24 = vpop.f32.mrb[32].mxu1 }
0x18b6   :  { %v3653_v25 = vadd.f32 %v4437_v24, %v3897_v23  ;;  %v3647_v18 = vpop.f32.mrb[33].mxu1 }
0x18b7   :  { %v3648_v27 = vadd.f32 %v3897_v23, %v3647_v18 }
0x18b8   :  { %v3657_v28 = vadd.f32 %v3653_v25, %v5372_v63 }
0x18b9   :  { %v3656_v15 = vadd.f32 %v3648_v27, %v5352_v40 }
0x18ba   :  { %v3665_v30 = vsel %vm46_vm0, %v3657_v28, 0.0 }
0x18bb   :  { %3666 = vadd.xlane.f32.xlu1 %v3665_v30  ;;  %v3662_v31 = vsel %vm46_vm0, %v3656_v15, 0.0 }
0x18bc   :  { %3663 = vadd.xlane.f32.xlu0 %v3662_v31 }
0x1948   :  { %v3667_v53 = vpop.xlane.xlu1 %3666 }
0x1949   :  { %v3669_v34 = vmul.f32 0.03125, %v3667_v53  ;;  %v3664_v37 = vpop.xlane.xlu0 %3663 }
0x194a   :  { %v3668_v4 = vmul.f32 0.03125, %v3664_v37 }
0x194b   :  { %v3671_v38 = vsub.f32 %v3657_v28, %v3669_v34 }
0x194c   :  { %v3670_v35 = vsub.f32 %v3656_v15, %v3668_v4 }
0x194d   :  { %v3673_v36 = vmul.f32 %v3671_v38, %v3671_v38 }
0x194e   :  { %v3672_v32 = vmul.f32 %v3670_v35, %v3670_v35 }
0x194f   :  { %v3677_v26 = vsel %vm46_vm0, %v3673_v36, 0.0 }
0x1950   :  { %3678 = vadd.xlane.f32.xlu1 %v3677_v26  ;;  %v3674_v63 = vsel %vm46_vm0, %v3672_v32, 0.0 }
0x1951   :  { %3675 = vadd.xlane.f32.xlu0 %v3674_v63 }
0x19dd   :  { %v3679_v40 = vpop.xlane.xlu1 %3678 }
0x19de   :  { %v3681_v42 = vmul.f32 0.03125, %v3679_v40  ;;  %v3676_v43 = vpop.xlane.xlu0 %3675 }
0x19df   :  { %v3680_v45 = vmul.f32 0.03125, %v3676_v43 }
0x19e0   :  { %v3683_v46 = vadd.f32 1e-12, %v3681_v42 }
0x19e1   :  { %v3682_v47 = vadd.f32 1e-12, %v3680_v45 }
0x19e2   :  { %4705 = vrsqrt.f32 %v3683_v46 }
0x19e3   :  { %4707 = vrsqrt.f32 %v3682_v47 }
0x19ec   :  { %v4706_v48 = vpop.eup %4705 }
0x19ed   :  { %v4708_v41 = vpop.eup %4707  ;;  %v3687_v51 = vmul.f32 %v4706_v48, %v3671_v38 }
0x19ee   :  { %v3686_v33 = vmul.f32 %v4708_v41, %v3670_v35 }
0x19ef   :  { %v3695_v52 = vmul.f32 %v3900_v2, %v3687_v51 }
0x19f0   :  { %v3694_v54 = vmul.f32 %v3900_v2, %v3686_v33 }
0x19f1   :  { %v3703_v44 = vadd.f32 %v3901_v39, %v3695_v52 }
0x19f2   :  { %v3702_v49 = vadd.f32 %v3901_v39, %v3694_v54 }
0x19f3   :  { %3705 = vst.msk [vmem:[#allocation2 + $0x8] sm:$0xff] %vm46_vm0, %v3703_v44 }
0x19f4   :  { %3704 = vst.msk [vmem:[#allocation2] sm:$0xff] %vm46_vm0, %v3702_v49 }
0x19f5   :  { %4720 = shalt.err (!%p4717_p4)
}
0x19f6   :  { %s4721_s24 = scalar_lea.hbm %s5467_s9, 256 }
0x19f7   :  { %p4722_p5 = scmp.ne.s32.totalorder %s5467_s9, %s4721_s24  ;;  %p4725_p6 = scmp.lt.u32.totalorder %s4721_s24, %s5467_s9 }
0x19f9   :  { %p4727_p7 = pnand %p4725_p6, %p4722_p5 }
0x19fb   :  { %4730 = shalt.err (!%p4727_p7)
}
0x19fc   :  { %s4738_s28 = smov 128   ;;  %s4739_s29 = smov 8  }
0x19fd   :  { %3717 = dma.vmem_to_hbm [thread:$0]  %s3712_s22, 256, %s5467_s9, [#allocation3], %s4738_s28, %s4738_s28, %s4739_s29  }
0x19fe   :  { %4731 = dma.done.wait [#allocation3], 256  }
0x19ff   :  { %4732 = vsyncadd [#allocation3], 4294967040 }
0x1a00   :  { %3721 = vsyncpa [#allocation3], 1 }

</bundles_post_ra>
